<compile_context>
chip_gen: v6e
topology: v6e:2x2x1
jax: 0.10.0
libtpu: 0.0.40
codegen_flags: <defaults>
</compile_context>

<pallas_src>
import functools

import numpy as np
import jax
import jax.numpy as jnp
from jax.experimental import pallas as pl
from jax.experimental.pallas import tpu as pltpu

_HIGHEST = jax.lax.Precision.HIGHEST


def _pick_chunk(T, cap=16):
    """Largest divisor of T that is <= cap (timesteps per grid step)."""
    for c in range(min(T, cap), 0, -1):
        if T % c == 0:
            return c
    return 1


def _pick_time_tile(T, cap=256):
    """Time-tile for the epilogue kernel (keeps blocks a few MiB at large T)."""
    if T <= cap:
        return T
    for c in range(cap, 7, -1):
        if T % c == 0 and c % 8 == 0:
            return c
    return T


# ----------------------------------------------------------------------------
# Fused bidirectional LSTM layer kernel.
# grid = (T // chunk,); both directions advance `chunk` timesteps per grid step.
# Inputs are pre-projected gates gx = x @ W_ih^T + (b_ih + b_hh), so the serial
# part only does the (B, H) @ (H, 4H) hidden matmul per direction per step.
# Gate order matches PyTorch: i, f, g, o.
# ----------------------------------------------------------------------------
def _bilstm_layer_kernel(gxf_ref, gxr_ref, whf_ref, whr_ref,
                         hf_out_ref, hr_out_ref, hn_ref, cn_ref,
                         hf_sc, cf_sc, hr_sc, cr_sc, *, hidden, chunk):
    j = pl.program_id(0)

    @pl.when(j == 0)
    def _init():
        hf_sc[...] = jnp.zeros_like(hf_sc)
        cf_sc[...] = jnp.zeros_like(cf_sc)
        hr_sc[...] = jnp.zeros_like(hr_sc)
        cr_sc[...] = jnp.zeros_like(cr_sc)

    # TODO(synk): for very large hidden sizes, single-buffer the loop-invariant
    # W_hh blocks (pipeline_mode=pl.Buffered(1)) and/or cast them to bf16 to
    # halve VMEM residency (critical on v7x's 64 MiB VMEM).
    whf = whf_ref[...]          # (H, 4H), loop-invariant
    whr = whr_ref[...]

    def cell(gx, h, c, whh):
        gates = gx + jnp.dot(h, whh, preferred_element_type=jnp.float32)
        i_g = jax.nn.sigmoid(gates[:, 0 * hidden:1 * hidden])
        f_g = jax.nn.sigmoid(gates[:, 1 * hidden:2 * hidden])
        g_g = jnp.tanh(gates[:, 2 * hidden:3 * hidden])
        o_g = jax.nn.sigmoid(gates[:, 3 * hidden:4 * hidden])
        c_new = f_g * c + i_g * g_g
        h_new = o_g * jnp.tanh(c_new)
        return h_new, c_new

    # Statically unrolled chunk of the recurrence (amortizes per-grid-step cost).
    for s in range(chunk):
        # forward direction: global time t = j*chunk + s  -> row s of this block
        h_new, c_new = cell(gxf_ref[s], hf_sc[...], cf_sc[...], whf)
        hf_sc[...] = h_new
        cf_sc[...] = c_new
        hf_out_ref[s] = h_new

        # reverse direction: global time t = T-1-(j*chunk+s) -> row chunk-1-s of
        # the reversed-indexed block.
        r = chunk - 1 - s
        h_new, c_new = cell(gxr_ref[r], hr_sc[...], cr_sc[...], whr)
        hr_sc[...] = h_new
        cr_sc[...] = c_new
        hr_out_ref[r] = h_new

    @pl.when(j == pl.num_programs(0) - 1)
    def _final():
        hn_ref[0] = hf_sc[...]
        hn_ref[1] = hr_sc[...]
        cn_ref[0] = cf_sc[...]
        cn_ref[1] = cr_sc[...]


def bilstm_layer(gx_cat, whh_f_T, whh_r_T):
    """One bidirectional layer.

    gx_cat : (T, B, 8H) pre-projected input gates; [..., :4H] = forward-direction
             gates, [..., 4H:] = reverse-direction gates (PyTorch i,f,g,o order).
    whh_*_T: (H, 4H).
    Returns Hf (T,B,H), Hr (T,B,H), h_n (2,B,H), c_n (2,B,H).
    """
    T, B, G2 = gx_cat.shape
    hidden = whh_f_T.shape[0]
    G = 4 * hidden
    assert G2 == 2 * G
    chunk = _pick_chunk(T)
    nchunks = T // chunk

    if G % 128 == 0:
        # Lane-aligned gate width: feed the fused (T,B,8H) tensor twice with
        # different block views (no HBM split/copy of the gate tensor).
        gxf_in, gxr_in = gx_cat, gx_cat
        gxf_spec = pl.BlockSpec((chunk, B, G), lambda j: (j, 0, 0))
        gxr_spec = pl.BlockSpec((chunk, B, G), lambda j: (nchunks - 1 - j, 0, 1))
    else:
        # Fallback for unaligned 4H: split once in XLA (extra copy, always legal).
        gxf_in, gxr_in = gx_cat[..., :G], gx_cat[..., G:]
        gxf_spec = pl.BlockSpec((chunk, B, G), lambda j: (j, 0, 0))
        gxr_spec = pl.BlockSpec((chunk, B, G), lambda j: (nchunks - 1 - j, 0, 0))

    kernel = functools.partial(_bilstm_layer_kernel, hidden=hidden, chunk=chunk)

    return pl.pallas_call(
        kernel,
        out_shape=(jax.ShapeDtypeStruct((T, B, hidden), jnp.float32),
                   jax.ShapeDtypeStruct((T, B, hidden), jnp.float32),
                   jax.ShapeDtypeStruct((2, B, hidden), jnp.float32),
                   jax.ShapeDtypeStruct((2, B, hidden), jnp.float32)),
        grid_spec=pltpu.PrefetchScalarGridSpec(
            num_scalar_prefetch=0,
            grid=(nchunks,),
            in_specs=[
                gxf_spec,
                gxr_spec,
                pl.BlockSpec((hidden, G), lambda j: (0, 0)),
                pl.BlockSpec((hidden, G), lambda j: (0, 0)),
            ],
            out_specs=[
                pl.BlockSpec((chunk, B, hidden), lambda j: (j, 0, 0)),
                pl.BlockSpec((chunk, B, hidden), lambda j: (nchunks - 1 - j, 0, 0)),
                pl.BlockSpec((2, B, hidden), lambda j: (0, 0, 0)),
                pl.BlockSpec((2, B, hidden), lambda j: (0, 0, 0)),
            ],
            scratch_shapes=[pltpu.VMEM((B, hidden), jnp.float32)] * 4),
        compiler_params=pltpu.CompilerParams(
            dimension_semantics=("arbitrary",)),   # sequential recurrence
    )(gxf_in, gxr_in, whh_f_T, whh_r_T)


# ----------------------------------------------------------------------------
# Epilogue kernel: mask * (optional inverted dropout), concat fwd/rev, and fold
# the time-major -> batch-major transpose.  Tiled over time.
# Dropout randoms come from a counter-based hash (works on any backend; unique
# per element across tiles).
# ----------------------------------------------------------------------------
def _epilogue_kernel(hf_ref, hr_ref, m_ref, o_ref, *, pdrop, apply_dropout,
                     seed, t_tile, batch, feat):
    h = jnp.concatenate([hf_ref[...], hr_ref[...]], axis=-1)      # (Tt, B, 2H)
    h = h * m_ref[...][..., None]                                 # seq-len mask

    if apply_dropout and pdrop > 0.0:
        tt = pl.program_id(0)
        shape = h.shape
        t_ids = jax.lax.broadcasted_iota(jnp.int32, shape, 0) + tt * t_tile
        b_ids = jax.lax.broadcasted_iota(jnp.int32, shape, 1)
        f_ids = jax.lax.broadcasted_iota(jnp.int32, shape, 2)
        flat = (t_ids * batch + b_ids) * feat + f_ids             # globally unique
        x = flat.astype(jnp.uint32) ^ jnp.uint32(seed & 0xFFFFFFFF)
        x = x * jnp.uint32(0x9E3779B1)
        x = x ^ jax.lax.shift_right_logical(x, jnp.uint32(15))
        x = x * jnp.uint32(0x85EBCA77)
        x = x ^ jax.lax.shift_right_logical(x, jnp.uint32(13))
        x = x * jnp.uint32(0xC2B2AE3D)
        x = x ^ jax.lax.shift_right_logical(x, jnp.uint32(16))
        u = (jax.lax.shift_right_logical(x, jnp.uint32(8))
             .astype(jnp.int32).astype(jnp.float32)) * (1.0 / (1 << 24))
        keep = u >= jnp.float32(pdrop)
        h = jnp.where(keep, h * (1.0 / (1.0 - pdrop)), 0.0)

    o_ref[...] = jnp.transpose(h, (1, 0, 2))                      # (B, Tt, 2H)


def mask_dropout_transpose(Hf, Hr, mask_tm, *, pdrop, apply_dropout, seed):
    T, B, hidden = Hf.shape
    t_tile = _pick_time_tile(T)
    n_t = T // t_tile
    kernel = functools.partial(_epilogue_kernel, pdrop=float(pdrop),
                               apply_dropout=bool(apply_dropout), seed=int(seed),
                               t_tile=t_tile, batch=B, feat=2 * hidden)
    return pl.pallas_call(
        kernel,
        out_shape=jax.ShapeDtypeStruct((B, T, 2 * hidden), jnp.float32),
        grid_spec=pltpu.PrefetchScalarGridSpec(
            num_scalar_prefetch=0,
            grid=(n_t,),
            in_specs=[
                pl.BlockSpec((t_tile, B, hidden), lambda i: (i, 0, 0)),
                pl.BlockSpec((t_tile, B, hidden), lambda i: (i, 0, 0)),
                pl.BlockSpec((t_tile, B), lambda i: (i, 0)),
            ],
            out_specs=pl.BlockSpec((B, t_tile, 2 * hidden), lambda i: (0, i, 0)),
        ),
        compiler_params=pltpu.CompilerParams(
            dimension_semantics=("parallel",)),
    )(Hf, Hr, mask_tm)


# ----------------------------------------------------------------------------
# Full BiLSTM forward (use_packing=False path of the PyTorch module).
# ----------------------------------------------------------------------------
def bilstm_forward(params, X, X_mask, *, pdrop=0.3, apply_dropout=True, seed=0):
    B, T, D = X.shape
    B_pad = ((B + 7) // 8) * 8                    # sublane fill
    pad = B_pad - B

    Xp = jnp.pad(X.astype(jnp.float32), ((0, pad), (0, 0), (0, 0)))
    if X_mask is None:
        maskp = jnp.ones((B_pad, T), jnp.float32)
    else:
        maskp = jnp.pad(X_mask.astype(jnp.float32), ((0, pad), (0, 0)))
    mask_tm = jnp.transpose(maskp, (1, 0))        # (T, B_pad)

    x_tm = jnp.transpose(Xp, (1, 0, 2))           # (T, B_pad, D) time-major
    Hf = Hr = None
    h_ns, c_ns = [], []
    for li, layer in enumerate(params):
        wih_f, whh_f, b_f = layer["fwd"]
        wih_r, whh_r, b_r = layer["rev"]
        hidden = whh_f.shape[0]
        b_cat = jnp.concatenate([b_f, b_r], axis=-1)              # (1, 8H)
        # Hoisted input projection: one large MXU-friendly matmul per layer,
        # producing both directions' gates as a fused (T, B, 8H) tensor.
        if li == 0:
            wih_cat = jnp.concatenate([wih_f, wih_r], axis=1)     # (D, 8H)
            gx_cat = jnp.dot(x_tm, wih_cat, precision=_HIGHEST) + b_cat
        else:
            # consume Hf/Hr directly (no inter-layer concat materialized)
            w_top = jnp.concatenate([wih_f[:hidden], wih_r[:hidden]], axis=1)
            w_bot = jnp.concatenate([wih_f[hidden:], wih_r[hidden:]], axis=1)
            gx_cat = (jnp.dot(Hf, w_top, precision=_HIGHEST)
                      + jnp.dot(Hr, w_bot, precision=_HIGHEST) + b_cat)
        Hf, Hr, hn, cn = bilstm_layer(gx_cat, whh_f, whh_r)
        h_ns.append(hn)
        c_ns.append(cn)

    H_pad = mask_dropout_transpose(Hf, Hr, mask_tm, pdrop=pdrop,
                                   apply_dropout=apply_dropout, seed=seed)
    H = H_pad[:B]                                  # drop batch padding
    h_n = jnp.concatenate(h_ns, axis=0)[:, :B]     # (2L, B, H), PyTorch order
    c_n = jnp.concatenate(c_ns, axis=0)[:, :B]
    return H, (h_n, c_n)


# ----------------------------------------------------------------------------
# Deterministic parameter init (PyTorch nn.LSTM: U(-1/sqrt(H), 1/sqrt(H))).
# Stored pre-transposed for MXU-friendly (x @ W^T) matmuls; b = b_ih + b_hh.
# ----------------------------------------------------------------------------
def init_params(key, n_layers, input_size, hidden):
    bound = 1.0 / np.sqrt(hidden)
    params = []
    for layer in range(n_layers):
        in_l = input_size if layer == 0 else 2 * hidden
        entry = {}
        for dname in ("fwd", "rev"):
            key, k1, k2, k3, k4 = jax.random.split(key, 5)
            w_ih = jax.random.uniform(k1, (4 * hidden, in_l), jnp.float32, -bound, bound)
            w_hh = jax.random.uniform(k2, (4 * hidden, hidden), jnp.float32, -bound, bound)
            b_ih = jax.random.uniform(k3, (4 * hidden,), jnp.float32, -bound, bound)
            b_hh = jax.random.uniform(k4, (4 * hidden,), jnp.float32, -bound, bound)
            entry[dname] = (w_ih.T, w_hh.T, (b_ih + b_hh).reshape(1, 4 * hidden))
        params.append(entry)
    return params


# ----------------------------------------------------------------------------
# Pure-JAX reference (for correctness check of the no-dropout path).
# ----------------------------------------------------------------------------
def _ref_direction(x_tm, wih_T, whh_T, b, reverse):
    T, B, _ = x_tm.shape
    hidden = whh_T.shape[0]
    xs = x_tm[::-1] if reverse else x_tm

    def step(carry, x_t):
        h, c = carry
        g = (jnp.dot(x_t, wih_T, precision=_HIGHEST)
             + jnp.dot(h, whh_T, precision=_HIGHEST) + b)
        i, f, gg, o = jnp.split(g, 4, axis=-1)
        i, f, o = jax.nn.sigmoid(i), jax.nn.sigmoid(f), jax.nn.sigmoid(o)
        gg = jnp.tanh(gg)
        c = f * c + i * gg
        h = o * jnp.tanh(c)
        return (h, c), h

    init = (jnp.zeros((B, hidden), jnp.float32), jnp.zeros((B, hidden), jnp.float32))
    (h_n, c_n), Hs = jax.lax.scan(step, init, xs)
    if reverse:
        Hs = Hs[::-1]
    return Hs, h_n, c_n


def ref_bilstm(params, X, X_mask):
    x_tm = jnp.transpose(X.astype(jnp.float32), (1, 0, 2))
    h_ns, c_ns = [], []
    for layer in params:
        Hf, hf, cf = _ref_direction(x_tm, *layer["fwd"], reverse=False)
        Hr, hr, cr = _ref_direction(x_tm, *layer["rev"], reverse=True)
        x_tm = jnp.concatenate([Hf, Hr], axis=-1)
        h_ns += [hf, hr]
        c_ns += [cf, cr]
    H = jnp.transpose(x_tm, (1, 0, 2)) * X_mask.astype(jnp.float32)[..., None]
    return H, jnp.stack(h_ns, 0), jnp.stack(c_ns, 0)


if __name__ == "__main__":
    B, T, D, HID, LAYERS = 2, 8, 16, 32, 2
    key = jax.random.PRNGKey(0)
    kx, kp = jax.random.split(key, 2)

    X = jax.random.normal(kx, (B, T, D), jnp.float32)
    lens = jnp.array([T, T - 3])
    X_mask = (jnp.arange(T)[None, :] < lens[:, None]).astype(jnp.float32)

    params = init_params(kp, LAYERS, D, HID)

    # Deterministic (dropout disabled, i.e. module.eval()) path: check vs reference.
    eval_fn = jax.jit(lambda p, x, m: bilstm_forward(
        p, x, m, pdrop=0.3, apply_dropout=False))
    H_out, (h_n, c_n) = eval_fn(params, X, X_mask)
    jax.block_until_ready(H_out)
    H_ref, hn_ref, cn_ref = ref_bilstm(params, X, X_mask)
    assert np.allclose(np.asarray(H_out), np.asarray(H_ref), atol=2e-3, rtol=2e-3)
    assert np.allclose(np.asarray(h_n), np.asarray(hn_ref), atol=2e-3, rtol=2e-3)
    assert np.allclose(np.asarray(c_n), np.asarray(cn_ref), atol=2e-3, rtol=2e-3)

    # Training-mode dropout path (in-kernel counter-hash RNG; stream differs from torch).
    train_fn = jax.jit(lambda p, x, m: bilstm_forward(
        p, x, m, pdrop=0.3, apply_dropout=True, seed=42))
    H_drop, _ = train_fn(params, X, X_mask)
    jax.block_until_ready(H_drop)

    # TODO(synk): pack_padded_sequence/pad_packed_sequence (use_packing=True) path
    # is not implemented; the default use_packing=False path is reproduced.
    print("KERNEL_OK")
</pallas_src>

<mosaic_0001>
module attributes {stable_mosaic.version = 11 : i64} {
  func.func @_bilstm_layer_kernel(%arg0: i32, %arg1: memref<8x8x128xf32, #tpu.memory_space<vmem>>, %arg2: memref<8x8x128xf32, #tpu.memory_space<vmem>>, %arg3: memref<32x128xf32, #tpu.memory_space<vmem>>, %arg4: memref<32x128xf32, #tpu.memory_space<vmem>>, %arg5: memref<8x8x32xf32, #tpu.memory_space<vmem>>, %arg6: memref<8x8x32xf32, #tpu.memory_space<vmem>>, %arg7: memref<2x8x32xf32, #tpu.memory_space<vmem>>, %arg8: memref<2x8x32xf32, #tpu.memory_space<vmem>>, %arg9: memref<8x32xf32, #tpu.memory_space<vmem>>, %arg10: memref<8x32xf32, #tpu.memory_space<vmem>>, %arg11: memref<8x32xf32, #tpu.memory_space<vmem>>, %arg12: memref<8x32xf32, #tpu.memory_space<vmem>>) attributes {dimension_semantics = [#tpu.dimension_semantics<arbitrary>], iteration_bounds = array<i64: 1>, scalar_prefetch = 0 : i64, scratch_operands = 4 : i64, tpu.core_type = #tpu.core_type<tc>, window_params = [{transform_indices = @transform_0, window_bounds = array<i64: 8, 8, 128>}, {transform_indices = @transform_1, window_bounds = array<i64: 8, 8, 128>}, {pipeline_mode = #tpu.pipeline_mode<synchronous>, transform_indices = @transform_2, window_bounds = array<i64: 32, 128>}, {pipeline_mode = #tpu.pipeline_mode<synchronous>, transform_indices = @transform_3, window_bounds = array<i64: 32, 128>}, {transform_indices = @transform_4, window_bounds = array<i64: 8, 8, 32>}, {transform_indices = @transform_5, window_bounds = array<i64: 8, 8, 32>}, {pipeline_mode = #tpu.pipeline_mode<synchronous>, transform_indices = @transform_6, window_bounds = array<i64: 2, 8, 32>}, {pipeline_mode = #tpu.pipeline_mode<synchronous>, transform_indices = @transform_7, window_bounds = array<i64: 2, 8, 32>}]} {
    %c0_i32 = arith.constant 0 : i32
    %0 = arith.cmpi eq, %arg0, %c0_i32 : i32
    %1 = arith.extui %0 : i1 to i32
    %c0_i32_0 = arith.constant 0 : i32
    %2 = arith.cmpi ne, %1, %c0_i32_0 : i32
    scf.if %2 {
      %cst_286 = arith.constant 0.000000e+00 : f32
      %584 = vector.broadcast %cst_286 : f32 to vector<8x32xf32>
      %c0_287 = arith.constant 0 : index
      %c0_288 = arith.constant 0 : index
      %585 = vector.load %arg9[%c0_287, %c0_288] : memref<8x32xf32, #tpu.memory_space<vmem>>, vector<8x32xf32>
      tpu.vector_store %arg9[%c0_287, %c0_288], %584 {strides = array<i32>} : memref<8x32xf32, #tpu.memory_space<vmem>>, vector<8x32xf32>,
      %cst_289 = arith.constant 0.000000e+00 : f32
      %586 = vector.broadcast %cst_289 : f32 to vector<8x32xf32>
      %c0_290 = arith.constant 0 : index
      %c0_291 = arith.constant 0 : index
      %587 = vector.load %arg10[%c0_290, %c0_291] : memref<8x32xf32, #tpu.memory_space<vmem>>, vector<8x32xf32>
      tpu.vector_store %arg10[%c0_290, %c0_291], %586 {strides = array<i32>} : memref<8x32xf32, #tpu.memory_space<vmem>>, vector<8x32xf32>,
      %cst_292 = arith.constant 0.000000e+00 : f32
      %588 = vector.broadcast %cst_292 : f32 to vector<8x32xf32>
      %c0_293 = arith.constant 0 : index
      %c0_294 = arith.constant 0 : index
      %589 = vector.load %arg11[%c0_293, %c0_294] : memref<8x32xf32, #tpu.memory_space<vmem>>, vector<8x32xf32>
      tpu.vector_store %arg11[%c0_293, %c0_294], %588 {strides = array<i32>} : memref<8x32xf32, #tpu.memory_space<vmem>>, vector<8x32xf32>,
      %cst_295 = arith.constant 0.000000e+00 : f32
      %590 = vector.broadcast %cst_295 : f32 to vector<8x32xf32>
      %c0_296 = arith.constant 0 : index
      %c0_297 = arith.constant 0 : index
      %591 = vector.load %arg12[%c0_296, %c0_297] : memref<8x32xf32, #tpu.memory_space<vmem>>, vector<8x32xf32>
      tpu.vector_store %arg12[%c0_296, %c0_297], %590 {strides = array<i32>} : memref<8x32xf32, #tpu.memory_space<vmem>>, vector<8x32xf32>,
    } else {
    }
    %c0 = arith.constant 0 : index
    %c0_1 = arith.constant 0 : index
    %3 = vector.load %arg3[%c0, %c0_1] : memref<32x128xf32, #tpu.memory_space<vmem>>, vector<32x128xf32>
    %c0_2 = arith.constant 0 : index
    %c0_3 = arith.constant 0 : index
    %4 = vector.load %arg4[%c0_2, %c0_3] : memref<32x128xf32, #tpu.memory_space<vmem>>, vector<32x128xf32>
    %c0_4 = arith.constant 0 : index
    %c0_5 = arith.constant 0 : index
    %c0_6 = arith.constant 0 : index
    %5 = vector.load %arg1[%c0_4, %c0_5, %c0_6] : memref<8x8x128xf32, #tpu.memory_space<vmem>>, vector<1x8x128xf32>
    %6 = vector.shape_cast %5 : vector<1x8x128xf32> to vector<8x128xf32>
    %c0_7 = arith.constant 0 : index
    %c0_8 = arith.constant 0 : index
    %7 = vector.load %arg9[%c0_7, %c0_8] : memref<8x32xf32, #tpu.memory_space<vmem>>, vector<8x32xf32>
    %c0_9 = arith.constant 0 : index
    %c0_10 = arith.constant 0 : index
    %8 = vector.load %arg10[%c0_9, %c0_10] : memref<8x32xf32, #tpu.memory_space<vmem>>, vector<8x32xf32>
    %cst = arith.constant dense<0.000000e+00> : vector<8x128xf32>
    %9 = tpu.matmul %7, %3, %cst {dimension_numbers = #tpu.dot_dimension_numbers<[1], [0], [0], [1], [0, 0, 1, 1], [], []>} : vector<8x32xf32>, vector<32x128xf32>, vector<8x128xf32> -> vector<8x128xf32>
    %10 = arith.addf %6, %9 : vector<8x128xf32>
    %11 = vector.extract_strided_slice %10 {offsets = [0, 0], sizes = [8, 32], strides = [1, 1]} : vector<8x128xf32> to vector<8x32xf32>
    %12 = arith.negf %11 : vector<8x32xf32>
    %13 = math.exp %12 : vector<8x32xf32>
    %cst_11 = arith.constant 1.000000e+00 : f32
    %14 = vector.broadcast %cst_11 : f32 to vector<8x32xf32>
    %15 = arith.addf %14, %13 : vector<8x32xf32>
    %16 = arith.divf %14, %15 : vector<8x32xf32>
    %17 = vector.extract_strided_slice %10 {offsets = [0, 32], sizes = [8, 32], strides = [1, 1]} : vector<8x128xf32> to vector<8x32xf32>
    %18 = arith.negf %17 : vector<8x32xf32>
    %19 = math.exp %18 : vector<8x32xf32>
    %cst_12 = arith.constant 1.000000e+00 : f32
    %20 = vector.broadcast %cst_12 : f32 to vector<8x32xf32>
    %21 = arith.addf %20, %19 : vector<8x32xf32>
    %22 = arith.divf %20, %21 : vector<8x32xf32>
    %23 = vector.extract_strided_slice %10 {offsets = [0, 64], sizes = [8, 32], strides = [1, 1]} : vector<8x128xf32> to vector<8x32xf32>
    %24 = math.tanh %23 : vector<8x32xf32>
    %25 = vector.extract_strided_slice %10 {offsets = [0, 96], sizes = [8, 32], strides = [1, 1]} : vector<8x128xf32> to vector<8x32xf32>
    %26 = arith.negf %25 : vector<8x32xf32>
    %27 = math.exp %26 : vector<8x32xf32>
    %cst_13 = arith.constant 1.000000e+00 : f32
    %28 = vector.broadcast %cst_13 : f32 to vector<8x32xf32>
    %29 = arith.addf %28, %27 : vector<8x32xf32>
    %30 = arith.divf %28, %29 : vector<8x32xf32>
    %31 = arith.mulf %22, %8 : vector<8x32xf32>
    %32 = arith.mulf %16, %24 : vector<8x32xf32>
    %33 = arith.addf %31, %32 : vector<8x32xf32>
    %34 = math.tanh %33 : vector<8x32xf32>
    %35 = arith.mulf %30, %34 : vector<8x32xf32>
    %c0_14 = arith.constant 0 : index
    %c0_15 = arith.constant 0 : index
    %36 = vector.load %arg9[%c0_14, %c0_15] : memref<8x32xf32, #tpu.memory_space<vmem>>, vector<8x32xf32>
    tpu.vector_store %arg9[%c0_14, %c0_15], %35 {strides = array<i32>} : memref<8x32xf32, #tpu.memory_space<vmem>>, vector<8x32xf32>,
    %c0_16 = arith.constant 0 : index
    %c0_17 = arith.constant 0 : index
    %37 = vector.load %arg10[%c0_16, %c0_17] : memref<8x32xf32, #tpu.memory_space<vmem>>, vector<8x32xf32>
    tpu.vector_store %arg10[%c0_16, %c0_17], %33 {strides = array<i32>} : memref<8x32xf32, #tpu.memory_space<vmem>>, vector<8x32xf32>,
    %c0_18 = arith.constant 0 : index
    %c0_19 = arith.constant 0 : index
    %c0_20 = arith.constant 0 : index
    %38 = vector.load %arg5[%c0_18, %c0_19, %c0_20] : memref<8x8x32xf32, #tpu.memory_space<vmem>>, vector<1x8x32xf32>
    %39 = vector.shape_cast %38 : vector<1x8x32xf32> to vector<8x32xf32>
    %40 = vector.shape_cast %35 : vector<8x32xf32> to vector<1x8x32xf32>
    tpu.vector_store %arg5[%c0_18, %c0_19, %c0_20], %40 {strides = array<i32>} : memref<8x8x32xf32, #tpu.memory_space<vmem>>, vector<1x8x32xf32>,
    %c7 = arith.constant 7 : index
    %c0_21 = arith.constant 0 : index
    %c0_22 = arith.constant 0 : index
    %41 = vector.load %arg2[%c7, %c0_21, %c0_22] : memref<8x8x128xf32, #tpu.memory_space<vmem>>, vector<1x8x128xf32>
    %42 = vector.shape_cast %41 : vector<1x8x128xf32> to vector<8x128xf32>
    %c0_23 = arith.constant 0 : index
    %c0_24 = arith.constant 0 : index
    %43 = vector.load %arg11[%c0_23, %c0_24] : memref<8x32xf32, #tpu.memory_space<vmem>>, vector<8x32xf32>
    %c0_25 = arith.constant 0 : index
    %c0_26 = arith.constant 0 : index
    %44 = vector.load %arg12[%c0_25, %c0_26] : memref<8x32xf32, #tpu.memory_space<vmem>>, vector<8x32xf32>
    %cst_27 = arith.constant dense<0.000000e+00> : vector<8x128xf32>
    %45 = tpu.matmul %43, %4, %cst_27 {dimension_numbers = #tpu.dot_dimension_numbers<[1], [0], [0], [1], [0, 0, 1, 1], [], []>} : vector<8x32xf32>, vector<32x128xf32>, vector<8x128xf32> -> vector<8x128xf32>
    %46 = arith.addf %42, %45 : vector<8x128xf32>
    %47 = vector.extract_strided_slice %46 {offsets = [0, 0], sizes = [8, 32], strides = [1, 1]} : vector<8x128xf32> to vector<8x32xf32>
    %48 = arith.negf %47 : vector<8x32xf32>
    %49 = math.exp %48 : vector<8x32xf32>
    %cst_28 = arith.constant 1.000000e+00 : f32
    %50 = vector.broadcast %cst_28 : f32 to vector<8x32xf32>
    %51 = arith.addf %50, %49 : vector<8x32xf32>
    %52 = arith.divf %50, %51 : vector<8x32xf32>
    %53 = vector.extract_strided_slice %46 {offsets = [0, 32], sizes = [8, 32], strides = [1, 1]} : vector<8x128xf32> to vector<8x32xf32>
    %54 = arith.negf %53 : vector<8x32xf32>
    %55 = math.exp %54 : vector<8x32xf32>
    %cst_29 = arith.constant 1.000000e+00 : f32
    %56 = vector.broadcast %cst_29 : f32 to vector<8x32xf32>
    %57 = arith.addf %56, %55 : vector<8x32xf32>
    %58 = arith.divf %56, %57 : vector<8x32xf32>
    %59 = vector.extract_strided_slice %46 {offsets = [0, 64], sizes = [8, 32], strides = [1, 1]} : vector<8x128xf32> to vector<8x32xf32>
    %60 = math.tanh %59 : vector<8x32xf32>
    %61 = vector.extract_strided_slice %46 {offsets = [0, 96], sizes = [8, 32], strides = [1, 1]} : vector<8x128xf32> to vector<8x32xf32>
    %62 = arith.negf %61 : vector<8x32xf32>
    %63 = math.exp %62 : vector<8x32xf32>
    %cst_30 = arith.constant 1.000000e+00 : f32
    %64 = vector.broadcast %cst_30 : f32 to vector<8x32xf32>
    %65 = arith.addf %64, %63 : vector<8x32xf32>
    %66 = arith.divf %64, %65 : vector<8x32xf32>
    %67 = arith.mulf %58, %44 : vector<8x32xf32>
    %68 = arith.mulf %52, %60 : vector<8x32xf32>
    %69 = arith.addf %67, %68 : vector<8x32xf32>
    %70 = math.tanh %69 : vector<8x32xf32>
    %71 = arith.mulf %66, %70 : vector<8x32xf32>
    %c0_31 = arith.constant 0 : index
    %c0_32 = arith.constant 0 : index
    %72 = vector.load %arg11[%c0_31, %c0_32] : memref<8x32xf32, #tpu.memory_space<vmem>>, vector<8x32xf32>
    tpu.vector_store %arg11[%c0_31, %c0_32], %71 {strides = array<i32>} : memref<8x32xf32, #tpu.memory_space<vmem>>, vector<8x32xf32>,
    %c0_33 = arith.constant 0 : index
    %c0_34 = arith.constant 0 : index
    %73 = vector.load %arg12[%c0_33, %c0_34] : memref<8x32xf32, #tpu.memory_space<vmem>>, vector<8x32xf32>
    tpu.vector_store %arg12[%c0_33, %c0_34], %69 {strides = array<i32>} : memref<8x32xf32, #tpu.memory_space<vmem>>, vector<8x32xf32>,
    %c7_35 = arith.constant 7 : index
    %c0_36 = arith.constant 0 : index
    %c0_37 = arith.constant 0 : index
    %74 = vector.load %arg6[%c7_35, %c0_36, %c0_37] : memref<8x8x32xf32, #tpu.memory_space<vmem>>, vector<1x8x32xf32>
    %75 = vector.shape_cast %74 : vector<1x8x32xf32> to vector<8x32xf32>
    %76 = vector.shape_cast %71 : vector<8x32xf32> to vector<1x8x32xf32>
    tpu.vector_store %arg6[%c7_35, %c0_36, %c0_37], %76 {strides = array<i32>} : memref<8x8x32xf32, #tpu.memory_space<vmem>>, vector<1x8x32xf32>,
    %c1 = arith.constant 1 : index
    %c0_38 = arith.constant 0 : index
    %c0_39 = arith.constant 0 : index
    %77 = vector.load %arg1[%c1, %c0_38, %c0_39] : memref<8x8x128xf32, #tpu.memory_space<vmem>>, vector<1x8x128xf32>
    %78 = vector.shape_cast %77 : vector<1x8x128xf32> to vector<8x128xf32>
    %c0_40 = arith.constant 0 : index
    %c0_41 = arith.constant 0 : index
    %79 = vector.load %arg9[%c0_40, %c0_41] : memref<8x32xf32, #tpu.memory_space<vmem>>, vector<8x32xf32>
    %c0_42 = arith.constant 0 : index
    %c0_43 = arith.constant 0 : index
    %80 = vector.load %arg10[%c0_42, %c0_43] : memref<8x32xf32, #tpu.memory_space<vmem>>, vector<8x32xf32>
    %cst_44 = arith.constant dense<0.000000e+00> : vector<8x128xf32>
    %81 = tpu.matmul %79, %3, %cst_44 {dimension_numbers = #tpu.dot_dimension_numbers<[1], [0], [0], [1], [0, 0, 1, 1], [], []>} : vector<8x32xf32>, vector<32x128xf32>, vector<8x128xf32> -> vector<8x128xf32>
    %82 = arith.addf %78, %81 : vector<8x128xf32>
    %83 = vector.extract_strided_slice %82 {offsets = [0, 0], sizes = [8, 32], strides = [1, 1]} : vector<8x128xf32> to vector<8x32xf32>
    %84 = arith.negf %83 : vector<8x32xf32>
    %85 = math.exp %84 : vector<8x32xf32>
    %cst_45 = arith.constant 1.000000e+00 : f32
    %86 = vector.broadcast %cst_45 : f32 to vector<8x32xf32>
    %87 = arith.addf %86, %85 : vector<8x32xf32>
    %88 = arith.divf %86, %87 : vector<8x32xf32>
    %89 = vector.extract_strided_slice %82 {offsets = [0, 32], sizes = [8, 32], strides = [1, 1]} : vector<8x128xf32> to vector<8x32xf32>
    %90 = arith.negf %89 : vector<8x32xf32>
    %91 = math.exp %90 : vector<8x32xf32>
    %cst_46 = arith.constant 1.000000e+00 : f32
    %92 = vector.broadcast %cst_46 : f32 to vector<8x32xf32>
    %93 = arith.addf %92, %91 : vector<8x32xf32>
    %94 = arith.divf %92, %93 : vector<8x32xf32>
    %95 = vector.extract_strided_slice %82 {offsets = [0, 64], sizes = [8, 32], strides = [1, 1]} : vector<8x128xf32> to vector<8x32xf32>
    %96 = math.tanh %95 : vector<8x32xf32>
    %97 = vector.extract_strided_slice %82 {offsets = [0, 96], sizes = [8, 32], strides = [1, 1]} : vector<8x128xf32> to vector<8x32xf32>
    %98 = arith.negf %97 : vector<8x32xf32>
    %99 = math.exp %98 : vector<8x32xf32>
    %cst_47 = arith.constant 1.000000e+00 : f32
    %100 = vector.broadcast %cst_47 : f32 to vector<8x32xf32>
    %101 = arith.addf %100, %99 : vector<8x32xf32>
    %102 = arith.divf %100, %101 : vector<8x32xf32>
    %103 = arith.mulf %94, %80 : vector<8x32xf32>
    %104 = arith.mulf %88, %96 : vector<8x32xf32>
    %105 = arith.addf %103, %104 : vector<8x32xf32>
    %106 = math.tanh %105 : vector<8x32xf32>
    %107 = arith.mulf %102, %106 : vector<8x32xf32>
    %c0_48 = arith.constant 0 : index
    %c0_49 = arith.constant 0 : index
    %108 = vector.load %arg9[%c0_48, %c0_49] : memref<8x32xf32, #tpu.memory_space<vmem>>, vector<8x32xf32>
    tpu.vector_store %arg9[%c0_48, %c0_49], %107 {strides = array<i32>} : memref<8x32xf32, #tpu.memory_space<vmem>>, vector<8x32xf32>,
    %c0_50 = arith.constant 0 : index
    %c0_51 = arith.constant 0 : index
    %109 = vector.load %arg10[%c0_50, %c0_51] : memref<8x32xf32, #tpu.memory_space<vmem>>, vector<8x32xf32>
    tpu.vector_store %arg10[%c0_50, %c0_51], %105 {strides = array<i32>} : memref<8x32xf32, #tpu.memory_space<vmem>>, vector<8x32xf32>,
    %c1_52 = arith.constant 1 : index
    %c0_53 = arith.constant 0 : index
    %c0_54 = arith.constant 0 : index
    %110 = vector.load %arg5[%c1_52, %c0_53, %c0_54] : memref<8x8x32xf32, #tpu.memory_space<vmem>>, vector<1x8x32xf32>
    %111 = vector.shape_cast %110 : vector<1x8x32xf32> to vector<8x32xf32>
    %112 = vector.shape_cast %107 : vector<8x32xf32> to vector<1x8x32xf32>
    tpu.vector_store %arg5[%c1_52, %c0_53, %c0_54], %112 {strides = array<i32>} : memref<8x8x32xf32, #tpu.memory_space<vmem>>, vector<1x8x32xf32>,
    %c6 = arith.constant 6 : index
    %c0_55 = arith.constant 0 : index
    %c0_56 = arith.constant 0 : index
    %113 = vector.load %arg2[%c6, %c0_55, %c0_56] : memref<8x8x128xf32, #tpu.memory_space<vmem>>, vector<1x8x128xf32>
    %114 = vector.shape_cast %113 : vector<1x8x128xf32> to vector<8x128xf32>
    %c0_57 = arith.constant 0 : index
    %c0_58 = arith.constant 0 : index
    %115 = vector.load %arg11[%c0_57, %c0_58] : memref<8x32xf32, #tpu.memory_space<vmem>>, vector<8x32xf32>
    %c0_59 = arith.constant 0 : index
    %c0_60 = arith.constant 0 : index
    %116 = vector.load %arg12[%c0_59, %c0_60] : memref<8x32xf32, #tpu.memory_space<vmem>>, vector<8x32xf32>
    %cst_61 = arith.constant dense<0.000000e+00> : vector<8x128xf32>
    %117 = tpu.matmul %115, %4, %cst_61 {dimension_numbers = #tpu.dot_dimension_numbers<[1], [0], [0], [1], [0, 0, 1, 1], [], []>} : vector<8x32xf32>, vector<32x128xf32>, vector<8x128xf32> -> vector<8x128xf32>
    %118 = arith.addf %114, %117 : vector<8x128xf32>
    %119 = vector.extract_strided_slice %118 {offsets = [0, 0], sizes = [8, 32], strides = [1, 1]} : vector<8x128xf32> to vector<8x32xf32>
    %120 = arith.negf %119 : vector<8x32xf32>
    %121 = math.exp %120 : vector<8x32xf32>
    %cst_62 = arith.constant 1.000000e+00 : f32
    %122 = vector.broadcast %cst_62 : f32 to vector<8x32xf32>
    %123 = arith.addf %122, %121 : vector<8x32xf32>
    %124 = arith.divf %122, %123 : vector<8x32xf32>
    %125 = vector.extract_strided_slice %118 {offsets = [0, 32], sizes = [8, 32], strides = [1, 1]} : vector<8x128xf32> to vector<8x32xf32>
    %126 = arith.negf %125 : vector<8x32xf32>
    %127 = math.exp %126 : vector<8x32xf32>
    %cst_63 = arith.constant 1.000000e+00 : f32
    %128 = vector.broadcast %cst_63 : f32 to vector<8x32xf32>
    %129 = arith.addf %128, %127 : vector<8x32xf32>
    %130 = arith.divf %128, %129 : vector<8x32xf32>
    %131 = vector.extract_strided_slice %118 {offsets = [0, 64], sizes = [8, 32], strides = [1, 1]} : vector<8x128xf32> to vector<8x32xf32>
    %132 = math.tanh %131 : vector<8x32xf32>
    %133 = vector.extract_strided_slice %118 {offsets = [0, 96], sizes = [8, 32], strides = [1, 1]} : vector<8x128xf32> to vector<8x32xf32>
    %134 = arith.negf %133 : vector<8x32xf32>
    %135 = math.exp %134 : vector<8x32xf32>
    %cst_64 = arith.constant 1.000000e+00 : f32
    %136 = vector.broadcast %cst_64 : f32 to vector<8x32xf32>
    %137 = arith.addf %136, %135 : vector<8x32xf32>
    %138 = arith.divf %136, %137 : vector<8x32xf32>
    %139 = arith.mulf %130, %116 : vector<8x32xf32>
    %140 = arith.mulf %124, %132 : vector<8x32xf32>
    %141 = arith.addf %139, %140 : vector<8x32xf32>
    %142 = math.tanh %141 : vector<8x32xf32>
    %143 = arith.mulf %138, %142 : vector<8x32xf32>
    %c0_65 = arith.constant 0 : index
    %c0_66 = arith.constant 0 : index
    %144 = vector.load %arg11[%c0_65, %c0_66] : memref<8x32xf32, #tpu.memory_space<vmem>>, vector<8x32xf32>
    tpu.vector_store %arg11[%c0_65, %c0_66], %143 {strides = array<i32>} : memref<8x32xf32, #tpu.memory_space<vmem>>, vector<8x32xf32>,
    %c0_67 = arith.constant 0 : index
    %c0_68 = arith.constant 0 : index
    %145 = vector.load %arg12[%c0_67, %c0_68] : memref<8x32xf32, #tpu.memory_space<vmem>>, vector<8x32xf32>
    tpu.vector_store %arg12[%c0_67, %c0_68], %141 {strides = array<i32>} : memref<8x32xf32, #tpu.memory_space<vmem>>, vector<8x32xf32>,
    %c6_69 = arith.constant 6 : index
    %c0_70 = arith.constant 0 : index
    %c0_71 = arith.constant 0 : index
    %146 = vector.load %arg6[%c6_69, %c0_70, %c0_71] : memref<8x8x32xf32, #tpu.memory_space<vmem>>, vector<1x8x32xf32>
    %147 = vector.shape_cast %146 : vector<1x8x32xf32> to vector<8x32xf32>
    %148 = vector.shape_cast %143 : vector<8x32xf32> to vector<1x8x32xf32>
    tpu.vector_store %arg6[%c6_69, %c0_70, %c0_71], %148 {strides = array<i32>} : memref<8x8x32xf32, #tpu.memory_space<vmem>>, vector<1x8x32xf32>,
    %c2 = arith.constant 2 : index
    %c0_72 = arith.constant 0 : index
    %c0_73 = arith.constant 0 : index
    %149 = vector.load %arg1[%c2, %c0_72, %c0_73] : memref<8x8x128xf32, #tpu.memory_space<vmem>>, vector<1x8x128xf32>
    %150 = vector.shape_cast %149 : vector<1x8x128xf32> to vector<8x128xf32>
    %c0_74 = arith.constant 0 : index
    %c0_75 = arith.constant 0 : index
    %151 = vector.load %arg9[%c0_74, %c0_75] : memref<8x32xf32, #tpu.memory_space<vmem>>, vector<8x32xf32>
    %c0_76 = arith.constant 0 : index
    %c0_77 = arith.constant 0 : index
    %152 = vector.load %arg10[%c0_76, %c0_77] : memref<8x32xf32, #tpu.memory_space<vmem>>, vector<8x32xf32>
    %cst_78 = arith.constant dense<0.000000e+00> : vector<8x128xf32>
    %153 = tpu.matmul %151, %3, %cst_78 {dimension_numbers = #tpu.dot_dimension_numbers<[1], [0], [0], [1], [0, 0, 1, 1], [], []>} : vector<8x32xf32>, vector<32x128xf32>, vector<8x128xf32> -> vector<8x128xf32>
    %154 = arith.addf %150, %153 : vector<8x128xf32>
    %155 = vector.extract_strided_slice %154 {offsets = [0, 0], sizes = [8, 32], strides = [1, 1]} : vector<8x128xf32> to vector<8x32xf32>
    %156 = arith.negf %155 : vector<8x32xf32>
    %157 = math.exp %156 : vector<8x32xf32>
    %cst_79 = arith.constant 1.000000e+00 : f32
    %158 = vector.broadcast %cst_79 : f32 to vector<8x32xf32>
    %159 = arith.addf %158, %157 : vector<8x32xf32>
    %160 = arith.divf %158, %159 : vector<8x32xf32>
    %161 = vector.extract_strided_slice %154 {offsets = [0, 32], sizes = [8, 32], strides = [1, 1]} : vector<8x128xf32> to vector<8x32xf32>
    %162 = arith.negf %161 : vector<8x32xf32>
    %163 = math.exp %162 : vector<8x32xf32>
    %cst_80 = arith.constant 1.000000e+00 : f32
    %164 = vector.broadcast %cst_80 : f32 to vector<8x32xf32>
    %165 = arith.addf %164, %163 : vector<8x32xf32>
    %166 = arith.divf %164, %165 : vector<8x32xf32>
    %167 = vector.extract_strided_slice %154 {offsets = [0, 64], sizes = [8, 32], strides = [1, 1]} : vector<8x128xf32> to vector<8x32xf32>
    %168 = math.tanh %167 : vector<8x32xf32>
    %169 = vector.extract_strided_slice %154 {offsets = [0, 96], sizes = [8, 32], strides = [1, 1]} : vector<8x128xf32> to vector<8x32xf32>
    %170 = arith.negf %169 : vector<8x32xf32>
    %171 = math.exp %170 : vector<8x32xf32>
    %cst_81 = arith.constant 1.000000e+00 : f32
    %172 = vector.broadcast %cst_81 : f32 to vector<8x32xf32>
    %173 = arith.addf %172, %171 : vector<8x32xf32>
    %174 = arith.divf %172, %173 : vector<8x32xf32>
    %175 = arith.mulf %166, %152 : vector<8x32xf32>
    %176 = arith.mulf %160, %168 : vector<8x32xf32>
    %177 = arith.addf %175, %176 : vector<8x32xf32>
    %178 = math.tanh %177 : vector<8x32xf32>
    %179 = arith.mulf %174, %178 : vector<8x32xf32>
    %c0_82 = arith.constant 0 : index
    %c0_83 = arith.constant 0 : index
    %180 = vector.load %arg9[%c0_82, %c0_83] : memref<8x32xf32, #tpu.memory_space<vmem>>, vector<8x32xf32>
    tpu.vector_store %arg9[%c0_82, %c0_83], %179 {strides = array<i32>} : memref<8x32xf32, #tpu.memory_space<vmem>>, vector<8x32xf32>,
    %c0_84 = arith.constant 0 : index
    %c0_85 = arith.constant 0 : index
    %181 = vector.load %arg10[%c0_84, %c0_85] : memref<8x32xf32, #tpu.memory_space<vmem>>, vector<8x32xf32>
    tpu.vector_store %arg10[%c0_84, %c0_85], %177 {strides = array<i32>} : memref<8x32xf32, #tpu.memory_space<vmem>>, vector<8x32xf32>,
    %c2_86 = arith.constant 2 : index
    %c0_87 = arith.constant 0 : index
    %c0_88 = arith.constant 0 : index
    %182 = vector.load %arg5[%c2_86, %c0_87, %c0_88] : memref<8x8x32xf32, #tpu.memory_space<vmem>>, vector<1x8x32xf32>
    %183 = vector.shape_cast %182 : vector<1x8x32xf32> to vector<8x32xf32>
    %184 = vector.shape_cast %179 : vector<8x32xf32> to vector<1x8x32xf32>
    tpu.vector_store %arg5[%c2_86, %c0_87, %c0_88], %184 {strides = array<i32>} : memref<8x8x32xf32, #tpu.memory_space<vmem>>, vector<1x8x32xf32>,
    %c5 = arith.constant 5 : index
    %c0_89 = arith.constant 0 : index
    %c0_90 = arith.constant 0 : index
    %185 = vector.load %arg2[%c5, %c0_89, %c0_90] : memref<8x8x128xf32, #tpu.memory_space<vmem>>, vector<1x8x128xf32>
    %186 = vector.shape_cast %185 : vector<1x8x128xf32> to vector<8x128xf32>
    %c0_91 = arith.constant 0 : index
    %c0_92 = arith.constant 0 : index
    %187 = vector.load %arg11[%c0_91, %c0_92] : memref<8x32xf32, #tpu.memory_space<vmem>>, vector<8x32xf32>
    %c0_93 = arith.constant 0 : index
    %c0_94 = arith.constant 0 : index
    %188 = vector.load %arg12[%c0_93, %c0_94] : memref<8x32xf32, #tpu.memory_space<vmem>>, vector<8x32xf32>
    %cst_95 = arith.constant dense<0.000000e+00> : vector<8x128xf32>
    %189 = tpu.matmul %187, %4, %cst_95 {dimension_numbers = #tpu.dot_dimension_numbers<[1], [0], [0], [1], [0, 0, 1, 1], [], []>} : vector<8x32xf32>, vector<32x128xf32>, vector<8x128xf32> -> vector<8x128xf32>
    %190 = arith.addf %186, %189 : vector<8x128xf32>
    %191 = vector.extract_strided_slice %190 {offsets = [0, 0], sizes = [8, 32], strides = [1, 1]} : vector<8x128xf32> to vector<8x32xf32>
    %192 = arith.negf %191 : vector<8x32xf32>
    %193 = math.exp %192 : vector<8x32xf32>
    %cst_96 = arith.constant 1.000000e+00 : f32
    %194 = vector.broadcast %cst_96 : f32 to vector<8x32xf32>
    %195 = arith.addf %194, %193 : vector<8x32xf32>
    %196 = arith.divf %194, %195 : vector<8x32xf32>
    %197 = vector.extract_strided_slice %190 {offsets = [0, 32], sizes = [8, 32], strides = [1, 1]} : vector<8x128xf32> to vector<8x32xf32>
    %198 = arith.negf %197 : vector<8x32xf32>
    %199 = math.exp %198 : vector<8x32xf32>
    %cst_97 = arith.constant 1.000000e+00 : f32
    %200 = vector.broadcast %cst_97 : f32 to vector<8x32xf32>
    %201 = arith.addf %200, %199 : vector<8x32xf32>
    %202 = arith.divf %200, %201 : vector<8x32xf32>
    %203 = vector.extract_strided_slice %190 {offsets = [0, 64], sizes = [8, 32], strides = [1, 1]} : vector<8x128xf32> to vector<8x32xf32>
    %204 = math.tanh %203 : vector<8x32xf32>
    %205 = vector.extract_strided_slice %190 {offsets = [0, 96], sizes = [8, 32], strides = [1, 1]} : vector<8x128xf32> to vector<8x32xf32>
    %206 = arith.negf %205 : vector<8x32xf32>
    %207 = math.exp %206 : vector<8x32xf32>
    %cst_98 = arith.constant 1.000000e+00 : f32
    %208 = vector.broadcast %cst_98 : f32 to vector<8x32xf32>
    %209 = arith.addf %208, %207 : vector<8x32xf32>
    %210 = arith.divf %208, %209 : vector<8x32xf32>
    %211 = arith.mulf %202, %188 : vector<8x32xf32>
    %212 = arith.mulf %196, %204 : vector<8x32xf32>
    %213 = arith.addf %211, %212 : vector<8x32xf32>
    %214 = math.tanh %213 : vector<8x32xf32>
    %215 = arith.mulf %210, %214 : vector<8x32xf32>
    %c0_99 = arith.constant 0 : index
    %c0_100 = arith.constant 0 : index
    %216 = vector.load %arg11[%c0_99, %c0_100] : memref<8x32xf32, #tpu.memory_space<vmem>>, vector<8x32xf32>
    tpu.vector_store %arg11[%c0_99, %c0_100], %215 {strides = array<i32>} : memref<8x32xf32, #tpu.memory_space<vmem>>, vector<8x32xf32>,
    %c0_101 = arith.constant 0 : index
    %c0_102 = arith.constant 0 : index
    %217 = vector.load %arg12[%c0_101, %c0_102] : memref<8x32xf32, #tpu.memory_space<vmem>>, vector<8x32xf32>
    tpu.vector_store %arg12[%c0_101, %c0_102], %213 {strides = array<i32>} : memref<8x32xf32, #tpu.memory_space<vmem>>, vector<8x32xf32>,
    %c5_103 = arith.constant 5 : index
    %c0_104 = arith.constant 0 : index
    %c0_105 = arith.constant 0 : index
    %218 = vector.load %arg6[%c5_103, %c0_104, %c0_105] : memref<8x8x32xf32, #tpu.memory_space<vmem>>, vector<1x8x32xf32>
    %219 = vector.shape_cast %218 : vector<1x8x32xf32> to vector<8x32xf32>
    %220 = vector.shape_cast %215 : vector<8x32xf32> to vector<1x8x32xf32>
    tpu.vector_store %arg6[%c5_103, %c0_104, %c0_105], %220 {strides = array<i32>} : memref<8x8x32xf32, #tpu.memory_space<vmem>>, vector<1x8x32xf32>,
    %c3 = arith.constant 3 : index
    %c0_106 = arith.constant 0 : index
    %c0_107 = arith.constant 0 : index
    %221 = vector.load %arg1[%c3, %c0_106, %c0_107] : memref<8x8x128xf32, #tpu.memory_space<vmem>>, vector<1x8x128xf32>
    %222 = vector.shape_cast %221 : vector<1x8x128xf32> to vector<8x128xf32>
    %c0_108 = arith.constant 0 : index
    %c0_109 = arith.constant 0 : index
    %223 = vector.load %arg9[%c0_108, %c0_109] : memref<8x32xf32, #tpu.memory_space<vmem>>, vector<8x32xf32>
    %c0_110 = arith.constant 0 : index
    %c0_111 = arith.constant 0 : index
    %224 = vector.load %arg10[%c0_110, %c0_111] : memref<8x32xf32, #tpu.memory_space<vmem>>, vector<8x32xf32>
    %cst_112 = arith.constant dense<0.000000e+00> : vector<8x128xf32>
    %225 = tpu.matmul %223, %3, %cst_112 {dimension_numbers = #tpu.dot_dimension_numbers<[1], [0], [0], [1], [0, 0, 1, 1], [], []>} : vector<8x32xf32>, vector<32x128xf32>, vector<8x128xf32> -> vector<8x128xf32>
    %226 = arith.addf %222, %225 : vector<8x128xf32>
    %227 = vector.extract_strided_slice %226 {offsets = [0, 0], sizes = [8, 32], strides = [1, 1]} : vector<8x128xf32> to vector<8x32xf32>
    %228 = arith.negf %227 : vector<8x32xf32>
    %229 = math.exp %228 : vector<8x32xf32>
    %cst_113 = arith.constant 1.000000e+00 : f32
    %230 = vector.broadcast %cst_113 : f32 to vector<8x32xf32>
    %231 = arith.addf %230, %229 : vector<8x32xf32>
    %232 = arith.divf %230, %231 : vector<8x32xf32>
    %233 = vector.extract_strided_slice %226 {offsets = [0, 32], sizes = [8, 32], strides = [1, 1]} : vector<8x128xf32> to vector<8x32xf32>
    %234 = arith.negf %233 : vector<8x32xf32>
    %235 = math.exp %234 : vector<8x32xf32>
    %cst_114 = arith.constant 1.000000e+00 : f32
    %236 = vector.broadcast %cst_114 : f32 to vector<8x32xf32>
    %237 = arith.addf %236, %235 : vector<8x32xf32>
    %238 = arith.divf %236, %237 : vector<8x32xf32>
    %239 = vector.extract_strided_slice %226 {offsets = [0, 64], sizes = [8, 32], strides = [1, 1]} : vector<8x128xf32> to vector<8x32xf32>
    %240 = math.tanh %239 : vector<8x32xf32>
    %241 = vector.extract_strided_slice %226 {offsets = [0, 96], sizes = [8, 32], strides = [1, 1]} : vector<8x128xf32> to vector<8x32xf32>
    %242 = arith.negf %241 : vector<8x32xf32>
    %243 = math.exp %242 : vector<8x32xf32>
    %cst_115 = arith.constant 1.000000e+00 : f32
    %244 = vector.broadcast %cst_115 : f32 to vector<8x32xf32>
    %245 = arith.addf %244, %243 : vector<8x32xf32>
    %246 = arith.divf %244, %245 : vector<8x32xf32>
    %247 = arith.mulf %238, %224 : vector<8x32xf32>
    %248 = arith.mulf %232, %240 : vector<8x32xf32>
    %249 = arith.addf %247, %248 : vector<8x32xf32>
    %250 = math.tanh %249 : vector<8x32xf32>
    %251 = arith.mulf %246, %250 : vector<8x32xf32>
    %c0_116 = arith.constant 0 : index
    %c0_117 = arith.constant 0 : index
    %252 = vector.load %arg9[%c0_116, %c0_117] : memref<8x32xf32, #tpu.memory_space<vmem>>, vector<8x32xf32>
    tpu.vector_store %arg9[%c0_116, %c0_117], %251 {strides = array<i32>} : memref<8x32xf32, #tpu.memory_space<vmem>>, vector<8x32xf32>,
    %c0_118 = arith.constant 0 : index
    %c0_119 = arith.constant 0 : index
    %253 = vector.load %arg10[%c0_118, %c0_119] : memref<8x32xf32, #tpu.memory_space<vmem>>, vector<8x32xf32>
    tpu.vector_store %arg10[%c0_118, %c0_119], %249 {strides = array<i32>} : memref<8x32xf32, #tpu.memory_space<vmem>>, vector<8x32xf32>,
    %c3_120 = arith.constant 3 : index
    %c0_121 = arith.constant 0 : index
    %c0_122 = arith.constant 0 : index
    %254 = vector.load %arg5[%c3_120, %c0_121, %c0_122] : memref<8x8x32xf32, #tpu.memory_space<vmem>>, vector<1x8x32xf32>
    %255 = vector.shape_cast %254 : vector<1x8x32xf32> to vector<8x32xf32>
    %256 = vector.shape_cast %251 : vector<8x32xf32> to vector<1x8x32xf32>
    tpu.vector_store %arg5[%c3_120, %c0_121, %c0_122], %256 {strides = array<i32>} : memref<8x8x32xf32, #tpu.memory_space<vmem>>, vector<1x8x32xf32>,
    %c4 = arith.constant 4 : index
    %c0_123 = arith.constant 0 : index
    %c0_124 = arith.constant 0 : index
    %257 = vector.load %arg2[%c4, %c0_123, %c0_124] : memref<8x8x128xf32, #tpu.memory_space<vmem>>, vector<1x8x128xf32>
    %258 = vector.shape_cast %257 : vector<1x8x128xf32> to vector<8x128xf32>
    %c0_125 = arith.constant 0 : index
    %c0_126 = arith.constant 0 : index
    %259 = vector.load %arg11[%c0_125, %c0_126] : memref<8x32xf32, #tpu.memory_space<vmem>>, vector<8x32xf32>
    %c0_127 = arith.constant 0 : index
    %c0_128 = arith.constant 0 : index
    %260 = vector.load %arg12[%c0_127, %c0_128] : memref<8x32xf32, #tpu.memory_space<vmem>>, vector<8x32xf32>
    %cst_129 = arith.constant dense<0.000000e+00> : vector<8x128xf32>
    %261 = tpu.matmul %259, %4, %cst_129 {dimension_numbers = #tpu.dot_dimension_numbers<[1], [0], [0], [1], [0, 0, 1, 1], [], []>} : vector<8x32xf32>, vector<32x128xf32>, vector<8x128xf32> -> vector<8x128xf32>
    %262 = arith.addf %258, %261 : vector<8x128xf32>
    %263 = vector.extract_strided_slice %262 {offsets = [0, 0], sizes = [8, 32], strides = [1, 1]} : vector<8x128xf32> to vector<8x32xf32>
    %264 = arith.negf %263 : vector<8x32xf32>
    %265 = math.exp %264 : vector<8x32xf32>
    %cst_130 = arith.constant 1.000000e+00 : f32
    %266 = vector.broadcast %cst_130 : f32 to vector<8x32xf32>
    %267 = arith.addf %266, %265 : vector<8x32xf32>
    %268 = arith.divf %266, %267 : vector<8x32xf32>
    %269 = vector.extract_strided_slice %262 {offsets = [0, 32], sizes = [8, 32], strides = [1, 1]} : vector<8x128xf32> to vector<8x32xf32>
    %270 = arith.negf %269 : vector<8x32xf32>
    %271 = math.exp %270 : vector<8x32xf32>
    %cst_131 = arith.constant 1.000000e+00 : f32
    %272 = vector.broadcast %cst_131 : f32 to vector<8x32xf32>
    %273 = arith.addf %272, %271 : vector<8x32xf32>
    %274 = arith.divf %272, %273 : vector<8x32xf32>
    %275 = vector.extract_strided_slice %262 {offsets = [0, 64], sizes = [8, 32], strides = [1, 1]} : vector<8x128xf32> to vector<8x32xf32>
    %276 = math.tanh %275 : vector<8x32xf32>
    %277 = vector.extract_strided_slice %262 {offsets = [0, 96], sizes = [8, 32], strides = [1, 1]} : vector<8x128xf32> to vector<8x32xf32>
    %278 = arith.negf %277 : vector<8x32xf32>
    %279 = math.exp %278 : vector<8x32xf32>
    %cst_132 = arith.constant 1.000000e+00 : f32
    %280 = vector.broadcast %cst_132 : f32 to vector<8x32xf32>
    %281 = arith.addf %280, %279 : vector<8x32xf32>
    %282 = arith.divf %280, %281 : vector<8x32xf32>
    %283 = arith.mulf %274, %260 : vector<8x32xf32>
    %284 = arith.mulf %268, %276 : vector<8x32xf32>
    %285 = arith.addf %283, %284 : vector<8x32xf32>
    %286 = math.tanh %285 : vector<8x32xf32>
    %287 = arith.mulf %282, %286 : vector<8x32xf32>
    %c0_133 = arith.constant 0 : index
    %c0_134 = arith.constant 0 : index
    %288 = vector.load %arg11[%c0_133, %c0_134] : memref<8x32xf32, #tpu.memory_space<vmem>>, vector<8x32xf32>
    tpu.vector_store %arg11[%c0_133, %c0_134], %287 {strides = array<i32>} : memref<8x32xf32, #tpu.memory_space<vmem>>, vector<8x32xf32>,
    %c0_135 = arith.constant 0 : index
    %c0_136 = arith.constant 0 : index
    %289 = vector.load %arg12[%c0_135, %c0_136] : memref<8x32xf32, #tpu.memory_space<vmem>>, vector<8x32xf32>
    tpu.vector_store %arg12[%c0_135, %c0_136], %285 {strides = array<i32>} : memref<8x32xf32, #tpu.memory_space<vmem>>, vector<8x32xf32>,
    %c4_137 = arith.constant 4 : index
    %c0_138 = arith.constant 0 : index
    %c0_139 = arith.constant 0 : index
    %290 = vector.load %arg6[%c4_137, %c0_138, %c0_139] : memref<8x8x32xf32, #tpu.memory_space<vmem>>, vector<1x8x32xf32>
    %291 = vector.shape_cast %290 : vector<1x8x32xf32> to vector<8x32xf32>
    %292 = vector.shape_cast %287 : vector<8x32xf32> to vector<1x8x32xf32>
    tpu.vector_store %arg6[%c4_137, %c0_138, %c0_139], %292 {strides = array<i32>} : memref<8x8x32xf32, #tpu.memory_space<vmem>>, vector<1x8x32xf32>,
    %c4_140 = arith.constant 4 : index
    %c0_141 = arith.constant 0 : index
    %c0_142 = arith.constant 0 : index
    %293 = vector.load %arg1[%c4_140, %c0_141, %c0_142] : memref<8x8x128xf32, #tpu.memory_space<vmem>>, vector<1x8x128xf32>
    %294 = vector.shape_cast %293 : vector<1x8x128xf32> to vector<8x128xf32>
    %c0_143 = arith.constant 0 : index
    %c0_144 = arith.constant 0 : index
    %295 = vector.load %arg9[%c0_143, %c0_144] : memref<8x32xf32, #tpu.memory_space<vmem>>, vector<8x32xf32>
    %c0_145 = arith.constant 0 : index
    %c0_146 = arith.constant 0 : index
    %296 = vector.load %arg10[%c0_145, %c0_146] : memref<8x32xf32, #tpu.memory_space<vmem>>, vector<8x32xf32>
    %cst_147 = arith.constant dense<0.000000e+00> : vector<8x128xf32>
    %297 = tpu.matmul %295, %3, %cst_147 {dimension_numbers = #tpu.dot_dimension_numbers<[1], [0], [0], [1], [0, 0, 1, 1], [], []>} : vector<8x32xf32>, vector<32x128xf32>, vector<8x128xf32> -> vector<8x128xf32>
    %298 = arith.addf %294, %297 : vector<8x128xf32>
    %299 = vector.extract_strided_slice %298 {offsets = [0, 0], sizes = [8, 32], strides = [1, 1]} : vector<8x128xf32> to vector<8x32xf32>
    %300 = arith.negf %299 : vector<8x32xf32>
    %301 = math.exp %300 : vector<8x32xf32>
    %cst_148 = arith.constant 1.000000e+00 : f32
    %302 = vector.broadcast %cst_148 : f32 to vector<8x32xf32>
    %303 = arith.addf %302, %301 : vector<8x32xf32>
    %304 = arith.divf %302, %303 : vector<8x32xf32>
    %305 = vector.extract_strided_slice %298 {offsets = [0, 32], sizes = [8, 32], strides = [1, 1]} : vector<8x128xf32> to vector<8x32xf32>
    %306 = arith.negf %305 : vector<8x32xf32>
    %307 = math.exp %306 : vector<8x32xf32>
    %cst_149 = arith.constant 1.000000e+00 : f32
    %308 = vector.broadcast %cst_149 : f32 to vector<8x32xf32>
    %309 = arith.addf %308, %307 : vector<8x32xf32>
    %310 = arith.divf %308, %309 : vector<8x32xf32>
    %311 = vector.extract_strided_slice %298 {offsets = [0, 64], sizes = [8, 32], strides = [1, 1]} : vector<8x128xf32> to vector<8x32xf32>
    %312 = math.tanh %311 : vector<8x32xf32>
    %313 = vector.extract_strided_slice %298 {offsets = [0, 96], sizes = [8, 32], strides = [1, 1]} : vector<8x128xf32> to vector<8x32xf32>
    %314 = arith.negf %313 : vector<8x32xf32>
    %315 = math.exp %314 : vector<8x32xf32>
    %cst_150 = arith.constant 1.000000e+00 : f32
    %316 = vector.broadcast %cst_150 : f32 to vector<8x32xf32>
    %317 = arith.addf %316, %315 : vector<8x32xf32>
    %318 = arith.divf %316, %317 : vector<8x32xf32>
    %319 = arith.mulf %310, %296 : vector<8x32xf32>
    %320 = arith.mulf %304, %312 : vector<8x32xf32>
    %321 = arith.addf %319, %320 : vector<8x32xf32>
    %322 = math.tanh %321 : vector<8x32xf32>
    %323 = arith.mulf %318, %322 : vector<8x32xf32>
    %c0_151 = arith.constant 0 : index
    %c0_152 = arith.constant 0 : index
    %324 = vector.load %arg9[%c0_151, %c0_152] : memref<8x32xf32, #tpu.memory_space<vmem>>, vector<8x32xf32>
    tpu.vector_store %arg9[%c0_151, %c0_152], %323 {strides = array<i32>} : memref<8x32xf32, #tpu.memory_space<vmem>>, vector<8x32xf32>,
    %c0_153 = arith.constant 0 : index
    %c0_154 = arith.constant 0 : index
    %325 = vector.load %arg10[%c0_153, %c0_154] : memref<8x32xf32, #tpu.memory_space<vmem>>, vector<8x32xf32>
    tpu.vector_store %arg10[%c0_153, %c0_154], %321 {strides = array<i32>} : memref<8x32xf32, #tpu.memory_space<vmem>>, vector<8x32xf32>,
    %c4_155 = arith.constant 4 : index
    %c0_156 = arith.constant 0 : index
    %c0_157 = arith.constant 0 : index
    %326 = vector.load %arg5[%c4_155, %c0_156, %c0_157] : memref<8x8x32xf32, #tpu.memory_space<vmem>>, vector<1x8x32xf32>
    %327 = vector.shape_cast %326 : vector<1x8x32xf32> to vector<8x32xf32>
    %328 = vector.shape_cast %323 : vector<8x32xf32> to vector<1x8x32xf32>
    tpu.vector_store %arg5[%c4_155, %c0_156, %c0_157], %328 {strides = array<i32>} : memref<8x8x32xf32, #tpu.memory_space<vmem>>, vector<1x8x32xf32>,
    %c3_158 = arith.constant 3 : index
    %c0_159 = arith.constant 0 : index
    %c0_160 = arith.constant 0 : index
    %329 = vector.load %arg2[%c3_158, %c0_159, %c0_160] : memref<8x8x128xf32, #tpu.memory_space<vmem>>, vector<1x8x128xf32>
    %330 = vector.shape_cast %329 : vector<1x8x128xf32> to vector<8x128xf32>
    %c0_161 = arith.constant 0 : index
    %c0_162 = arith.constant 0 : index
    %331 = vector.load %arg11[%c0_161, %c0_162] : memref<8x32xf32, #tpu.memory_space<vmem>>, vector<8x32xf32>
    %c0_163 = arith.constant 0 : index
    %c0_164 = arith.constant 0 : index
    %332 = vector.load %arg12[%c0_163, %c0_164] : memref<8x32xf32, #tpu.memory_space<vmem>>, vector<8x32xf32>
    %cst_165 = arith.constant dense<0.000000e+00> : vector<8x128xf32>
    %333 = tpu.matmul %331, %4, %cst_165 {dimension_numbers = #tpu.dot_dimension_numbers<[1], [0], [0], [1], [0, 0, 1, 1], [], []>} : vector<8x32xf32>, vector<32x128xf32>, vector<8x128xf32> -> vector<8x128xf32>
    %334 = arith.addf %330, %333 : vector<8x128xf32>
    %335 = vector.extract_strided_slice %334 {offsets = [0, 0], sizes = [8, 32], strides = [1, 1]} : vector<8x128xf32> to vector<8x32xf32>
    %336 = arith.negf %335 : vector<8x32xf32>
    %337 = math.exp %336 : vector<8x32xf32>
    %cst_166 = arith.constant 1.000000e+00 : f32
    %338 = vector.broadcast %cst_166 : f32 to vector<8x32xf32>
    %339 = arith.addf %338, %337 : vector<8x32xf32>
    %340 = arith.divf %338, %339 : vector<8x32xf32>
    %341 = vector.extract_strided_slice %334 {offsets = [0, 32], sizes = [8, 32], strides = [1, 1]} : vector<8x128xf32> to vector<8x32xf32>
    %342 = arith.negf %341 : vector<8x32xf32>
    %343 = math.exp %342 : vector<8x32xf32>
    %cst_167 = arith.constant 1.000000e+00 : f32
    %344 = vector.broadcast %cst_167 : f32 to vector<8x32xf32>
    %345 = arith.addf %344, %343 : vector<8x32xf32>
    %346 = arith.divf %344, %345 : vector<8x32xf32>
    %347 = vector.extract_strided_slice %334 {offsets = [0, 64], sizes = [8, 32], strides = [1, 1]} : vector<8x128xf32> to vector<8x32xf32>
    %348 = math.tanh %347 : vector<8x32xf32>
    %349 = vector.extract_strided_slice %334 {offsets = [0, 96], sizes = [8, 32], strides = [1, 1]} : vector<8x128xf32> to vector<8x32xf32>
    %350 = arith.negf %349 : vector<8x32xf32>
    %351 = math.exp %350 : vector<8x32xf32>
    %cst_168 = arith.constant 1.000000e+00 : f32
    %352 = vector.broadcast %cst_168 : f32 to vector<8x32xf32>
    %353 = arith.addf %352, %351 : vector<8x32xf32>
    %354 = arith.divf %352, %353 : vector<8x32xf32>
    %355 = arith.mulf %346, %332 : vector<8x32xf32>
    %356 = arith.mulf %340, %348 : vector<8x32xf32>
    %357 = arith.addf %355, %356 : vector<8x32xf32>
    %358 = math.tanh %357 : vector<8x32xf32>
    %359 = arith.mulf %354, %358 : vector<8x32xf32>
    %c0_169 = arith.constant 0 : index
    %c0_170 = arith.constant 0 : index
    %360 = vector.load %arg11[%c0_169, %c0_170] : memref<8x32xf32, #tpu.memory_space<vmem>>, vector<8x32xf32>
    tpu.vector_store %arg11[%c0_169, %c0_170], %359 {strides = array<i32>} : memref<8x32xf32, #tpu.memory_space<vmem>>, vector<8x32xf32>,
    %c0_171 = arith.constant 0 : index
    %c0_172 = arith.constant 0 : index
    %361 = vector.load %arg12[%c0_171, %c0_172] : memref<8x32xf32, #tpu.memory_space<vmem>>, vector<8x32xf32>
    tpu.vector_store %arg12[%c0_171, %c0_172], %357 {strides = array<i32>} : memref<8x32xf32, #tpu.memory_space<vmem>>, vector<8x32xf32>,
    %c3_173 = arith.constant 3 : index
    %c0_174 = arith.constant 0 : index
    %c0_175 = arith.constant 0 : index
    %362 = vector.load %arg6[%c3_173, %c0_174, %c0_175] : memref<8x8x32xf32, #tpu.memory_space<vmem>>, vector<1x8x32xf32>
    %363 = vector.shape_cast %362 : vector<1x8x32xf32> to vector<8x32xf32>
    %364 = vector.shape_cast %359 : vector<8x32xf32> to vector<1x8x32xf32>
    tpu.vector_store %arg6[%c3_173, %c0_174, %c0_175], %364 {strides = array<i32>} : memref<8x8x32xf32, #tpu.memory_space<vmem>>, vector<1x8x32xf32>,
    %c5_176 = arith.constant 5 : index
    %c0_177 = arith.constant 0 : index
    %c0_178 = arith.constant 0 : index
    %365 = vector.load %arg1[%c5_176, %c0_177, %c0_178] : memref<8x8x128xf32, #tpu.memory_space<vmem>>, vector<1x8x128xf32>
    %366 = vector.shape_cast %365 : vector<1x8x128xf32> to vector<8x128xf32>
    %c0_179 = arith.constant 0 : index
    %c0_180 = arith.constant 0 : index
    %367 = vector.load %arg9[%c0_179, %c0_180] : memref<8x32xf32, #tpu.memory_space<vmem>>, vector<8x32xf32>
    %c0_181 = arith.constant 0 : index
    %c0_182 = arith.constant 0 : index
    %368 = vector.load %arg10[%c0_181, %c0_182] : memref<8x32xf32, #tpu.memory_space<vmem>>, vector<8x32xf32>
    %cst_183 = arith.constant dense<0.000000e+00> : vector<8x128xf32>
    %369 = tpu.matmul %367, %3, %cst_183 {dimension_numbers = #tpu.dot_dimension_numbers<[1], [0], [0], [1], [0, 0, 1, 1], [], []>} : vector<8x32xf32>, vector<32x128xf32>, vector<8x128xf32> -> vector<8x128xf32>
    %370 = arith.addf %366, %369 : vector<8x128xf32>
    %371 = vector.extract_strided_slice %370 {offsets = [0, 0], sizes = [8, 32], strides = [1, 1]} : vector<8x128xf32> to vector<8x32xf32>
    %372 = arith.negf %371 : vector<8x32xf32>
    %373 = math.exp %372 : vector<8x32xf32>
    %cst_184 = arith.constant 1.000000e+00 : f32
    %374 = vector.broadcast %cst_184 : f32 to vector<8x32xf32>
    %375 = arith.addf %374, %373 : vector<8x32xf32>
    %376 = arith.divf %374, %375 : vector<8x32xf32>
    %377 = vector.extract_strided_slice %370 {offsets = [0, 32], sizes = [8, 32], strides = [1, 1]} : vector<8x128xf32> to vector<8x32xf32>
    %378 = arith.negf %377 : vector<8x32xf32>
    %379 = math.exp %378 : vector<8x32xf32>
    %cst_185 = arith.constant 1.000000e+00 : f32
    %380 = vector.broadcast %cst_185 : f32 to vector<8x32xf32>
    %381 = arith.addf %380, %379 : vector<8x32xf32>
    %382 = arith.divf %380, %381 : vector<8x32xf32>
    %383 = vector.extract_strided_slice %370 {offsets = [0, 64], sizes = [8, 32], strides = [1, 1]} : vector<8x128xf32> to vector<8x32xf32>
    %384 = math.tanh %383 : vector<8x32xf32>
    %385 = vector.extract_strided_slice %370 {offsets = [0, 96], sizes = [8, 32], strides = [1, 1]} : vector<8x128xf32> to vector<8x32xf32>
    %386 = arith.negf %385 : vector<8x32xf32>
    %387 = math.exp %386 : vector<8x32xf32>
    %cst_186 = arith.constant 1.000000e+00 : f32
    %388 = vector.broadcast %cst_186 : f32 to vector<8x32xf32>
    %389 = arith.addf %388, %387 : vector<8x32xf32>
    %390 = arith.divf %388, %389 : vector<8x32xf32>
    %391 = arith.mulf %382, %368 : vector<8x32xf32>
    %392 = arith.mulf %376, %384 : vector<8x32xf32>
    %393 = arith.addf %391, %392 : vector<8x32xf32>
    %394 = math.tanh %393 : vector<8x32xf32>
    %395 = arith.mulf %390, %394 : vector<8x32xf32>
    %c0_187 = arith.constant 0 : index
    %c0_188 = arith.constant 0 : index
    %396 = vector.load %arg9[%c0_187, %c0_188] : memref<8x32xf32, #tpu.memory_space<vmem>>, vector<8x32xf32>
    tpu.vector_store %arg9[%c0_187, %c0_188], %395 {strides = array<i32>} : memref<8x32xf32, #tpu.memory_space<vmem>>, vector<8x32xf32>,
    %c0_189 = arith.constant 0 : index
    %c0_190 = arith.constant 0 : index
    %397 = vector.load %arg10[%c0_189, %c0_190] : memref<8x32xf32, #tpu.memory_space<vmem>>, vector<8x32xf32>
    tpu.vector_store %arg10[%c0_189, %c0_190], %393 {strides = array<i32>} : memref<8x32xf32, #tpu.memory_space<vmem>>, vector<8x32xf32>,
    %c5_191 = arith.constant 5 : index
    %c0_192 = arith.constant 0 : index
    %c0_193 = arith.constant 0 : index
    %398 = vector.load %arg5[%c5_191, %c0_192, %c0_193] : memref<8x8x32xf32, #tpu.memory_space<vmem>>, vector<1x8x32xf32>
    %399 = vector.shape_cast %398 : vector<1x8x32xf32> to vector<8x32xf32>
    %400 = vector.shape_cast %395 : vector<8x32xf32> to vector<1x8x32xf32>
    tpu.vector_store %arg5[%c5_191, %c0_192, %c0_193], %400 {strides = array<i32>} : memref<8x8x32xf32, #tpu.memory_space<vmem>>, vector<1x8x32xf32>,
    %c2_194 = arith.constant 2 : index
    %c0_195 = arith.constant 0 : index
    %c0_196 = arith.constant 0 : index
    %401 = vector.load %arg2[%c2_194, %c0_195, %c0_196] : memref<8x8x128xf32, #tpu.memory_space<vmem>>, vector<1x8x128xf32>
    %402 = vector.shape_cast %401 : vector<1x8x128xf32> to vector<8x128xf32>
    %c0_197 = arith.constant 0 : index
    %c0_198 = arith.constant 0 : index
    %403 = vector.load %arg11[%c0_197, %c0_198] : memref<8x32xf32, #tpu.memory_space<vmem>>, vector<8x32xf32>
    %c0_199 = arith.constant 0 : index
    %c0_200 = arith.constant 0 : index
    %404 = vector.load %arg12[%c0_199, %c0_200] : memref<8x32xf32, #tpu.memory_space<vmem>>, vector<8x32xf32>
    %cst_201 = arith.constant dense<0.000000e+00> : vector<8x128xf32>
    %405 = tpu.matmul %403, %4, %cst_201 {dimension_numbers = #tpu.dot_dimension_numbers<[1], [0], [0], [1], [0, 0, 1, 1], [], []>} : vector<8x32xf32>, vector<32x128xf32>, vector<8x128xf32> -> vector<8x128xf32>
    %406 = arith.addf %402, %405 : vector<8x128xf32>
    %407 = vector.extract_strided_slice %406 {offsets = [0, 0], sizes = [8, 32], strides = [1, 1]} : vector<8x128xf32> to vector<8x32xf32>
    %408 = arith.negf %407 : vector<8x32xf32>
    %409 = math.exp %408 : vector<8x32xf32>
    %cst_202 = arith.constant 1.000000e+00 : f32
    %410 = vector.broadcast %cst_202 : f32 to vector<8x32xf32>
    %411 = arith.addf %410, %409 : vector<8x32xf32>
    %412 = arith.divf %410, %411 : vector<8x32xf32>
    %413 = vector.extract_strided_slice %406 {offsets = [0, 32], sizes = [8, 32], strides = [1, 1]} : vector<8x128xf32> to vector<8x32xf32>
    %414 = arith.negf %413 : vector<8x32xf32>
    %415 = math.exp %414 : vector<8x32xf32>
    %cst_203 = arith.constant 1.000000e+00 : f32
    %416 = vector.broadcast %cst_203 : f32 to vector<8x32xf32>
    %417 = arith.addf %416, %415 : vector<8x32xf32>
    %418 = arith.divf %416, %417 : vector<8x32xf32>
    %419 = vector.extract_strided_slice %406 {offsets = [0, 64], sizes = [8, 32], strides = [1, 1]} : vector<8x128xf32> to vector<8x32xf32>
    %420 = math.tanh %419 : vector<8x32xf32>
    %421 = vector.extract_strided_slice %406 {offsets = [0, 96], sizes = [8, 32], strides = [1, 1]} : vector<8x128xf32> to vector<8x32xf32>
    %422 = arith.negf %421 : vector<8x32xf32>
    %423 = math.exp %422 : vector<8x32xf32>
    %cst_204 = arith.constant 1.000000e+00 : f32
    %424 = vector.broadcast %cst_204 : f32 to vector<8x32xf32>
    %425 = arith.addf %424, %423 : vector<8x32xf32>
    %426 = arith.divf %424, %425 : vector<8x32xf32>
    %427 = arith.mulf %418, %404 : vector<8x32xf32>
    %428 = arith.mulf %412, %420 : vector<8x32xf32>
    %429 = arith.addf %427, %428 : vector<8x32xf32>
    %430 = math.tanh %429 : vector<8x32xf32>
    %431 = arith.mulf %426, %430 : vector<8x32xf32>
    %c0_205 = arith.constant 0 : index
    %c0_206 = arith.constant 0 : index
    %432 = vector.load %arg11[%c0_205, %c0_206] : memref<8x32xf32, #tpu.memory_space<vmem>>, vector<8x32xf32>
    tpu.vector_store %arg11[%c0_205, %c0_206], %431 {strides = array<i32>} : memref<8x32xf32, #tpu.memory_space<vmem>>, vector<8x32xf32>,
    %c0_207 = arith.constant 0 : index
    %c0_208 = arith.constant 0 : index
    %433 = vector.load %arg12[%c0_207, %c0_208] : memref<8x32xf32, #tpu.memory_space<vmem>>, vector<8x32xf32>
    tpu.vector_store %arg12[%c0_207, %c0_208], %429 {strides = array<i32>} : memref<8x32xf32, #tpu.memory_space<vmem>>, vector<8x32xf32>,
    %c2_209 = arith.constant 2 : index
    %c0_210 = arith.constant 0 : index
    %c0_211 = arith.constant 0 : index
    %434 = vector.load %arg6[%c2_209, %c0_210, %c0_211] : memref<8x8x32xf32, #tpu.memory_space<vmem>>, vector<1x8x32xf32>
    %435 = vector.shape_cast %434 : vector<1x8x32xf32> to vector<8x32xf32>
    %436 = vector.shape_cast %431 : vector<8x32xf32> to vector<1x8x32xf32>
    tpu.vector_store %arg6[%c2_209, %c0_210, %c0_211], %436 {strides = array<i32>} : memref<8x8x32xf32, #tpu.memory_space<vmem>>, vector<1x8x32xf32>,
    %c6_212 = arith.constant 6 : index
    %c0_213 = arith.constant 0 : index
    %c0_214 = arith.constant 0 : index
    %437 = vector.load %arg1[%c6_212, %c0_213, %c0_214] : memref<8x8x128xf32, #tpu.memory_space<vmem>>, vector<1x8x128xf32>
    %438 = vector.shape_cast %437 : vector<1x8x128xf32> to vector<8x128xf32>
    %c0_215 = arith.constant 0 : index
    %c0_216 = arith.constant 0 : index
    %439 = vector.load %arg9[%c0_215, %c0_216] : memref<8x32xf32, #tpu.memory_space<vmem>>, vector<8x32xf32>
    %c0_217 = arith.constant 0 : index
    %c0_218 = arith.constant 0 : index
    %440 = vector.load %arg10[%c0_217, %c0_218] : memref<8x32xf32, #tpu.memory_space<vmem>>, vector<8x32xf32>
    %cst_219 = arith.constant dense<0.000000e+00> : vector<8x128xf32>
    %441 = tpu.matmul %439, %3, %cst_219 {dimension_numbers = #tpu.dot_dimension_numbers<[1], [0], [0], [1], [0, 0, 1, 1], [], []>} : vector<8x32xf32>, vector<32x128xf32>, vector<8x128xf32> -> vector<8x128xf32>
    %442 = arith.addf %438, %441 : vector<8x128xf32>
    %443 = vector.extract_strided_slice %442 {offsets = [0, 0], sizes = [8, 32], strides = [1, 1]} : vector<8x128xf32> to vector<8x32xf32>
    %444 = arith.negf %443 : vector<8x32xf32>
    %445 = math.exp %444 : vector<8x32xf32>
    %cst_220 = arith.constant 1.000000e+00 : f32
    %446 = vector.broadcast %cst_220 : f32 to vector<8x32xf32>
    %447 = arith.addf %446, %445 : vector<8x32xf32>
    %448 = arith.divf %446, %447 : vector<8x32xf32>
    %449 = vector.extract_strided_slice %442 {offsets = [0, 32], sizes = [8, 32], strides = [1, 1]} : vector<8x128xf32> to vector<8x32xf32>
    %450 = arith.negf %449 : vector<8x32xf32>
    %451 = math.exp %450 : vector<8x32xf32>
    %cst_221 = arith.constant 1.000000e+00 : f32
    %452 = vector.broadcast %cst_221 : f32 to vector<8x32xf32>
    %453 = arith.addf %452, %451 : vector<8x32xf32>
    %454 = arith.divf %452, %453 : vector<8x32xf32>
    %455 = vector.extract_strided_slice %442 {offsets = [0, 64], sizes = [8, 32], strides = [1, 1]} : vector<8x128xf32> to vector<8x32xf32>
    %456 = math.tanh %455 : vector<8x32xf32>
    %457 = vector.extract_strided_slice %442 {offsets = [0, 96], sizes = [8, 32], strides = [1, 1]} : vector<8x128xf32> to vector<8x32xf32>
    %458 = arith.negf %457 : vector<8x32xf32>
    %459 = math.exp %458 : vector<8x32xf32>
    %cst_222 = arith.constant 1.000000e+00 : f32
    %460 = vector.broadcast %cst_222 : f32 to vector<8x32xf32>
    %461 = arith.addf %460, %459 : vector<8x32xf32>
    %462 = arith.divf %460, %461 : vector<8x32xf32>
    %463 = arith.mulf %454, %440 : vector<8x32xf32>
    %464 = arith.mulf %448, %456 : vector<8x32xf32>
    %465 = arith.addf %463, %464 : vector<8x32xf32>
    %466 = math.tanh %465 : vector<8x32xf32>
    %467 = arith.mulf %462, %466 : vector<8x32xf32>
    %c0_223 = arith.constant 0 : index
    %c0_224 = arith.constant 0 : index
    %468 = vector.load %arg9[%c0_223, %c0_224] : memref<8x32xf32, #tpu.memory_space<vmem>>, vector<8x32xf32>
    tpu.vector_store %arg9[%c0_223, %c0_224], %467 {strides = array<i32>} : memref<8x32xf32, #tpu.memory_space<vmem>>, vector<8x32xf32>,
    %c0_225 = arith.constant 0 : index
    %c0_226 = arith.constant 0 : index
    %469 = vector.load %arg10[%c0_225, %c0_226] : memref<8x32xf32, #tpu.memory_space<vmem>>, vector<8x32xf32>
    tpu.vector_store %arg10[%c0_225, %c0_226], %465 {strides = array<i32>} : memref<8x32xf32, #tpu.memory_space<vmem>>, vector<8x32xf32>,
    %c6_227 = arith.constant 6 : index
    %c0_228 = arith.constant 0 : index
    %c0_229 = arith.constant 0 : index
    %470 = vector.load %arg5[%c6_227, %c0_228, %c0_229] : memref<8x8x32xf32, #tpu.memory_space<vmem>>, vector<1x8x32xf32>
    %471 = vector.shape_cast %470 : vector<1x8x32xf32> to vector<8x32xf32>
    %472 = vector.shape_cast %467 : vector<8x32xf32> to vector<1x8x32xf32>
    tpu.vector_store %arg5[%c6_227, %c0_228, %c0_229], %472 {strides = array<i32>} : memref<8x8x32xf32, #tpu.memory_space<vmem>>, vector<1x8x32xf32>,
    %c1_230 = arith.constant 1 : index
    %c0_231 = arith.constant 0 : index
    %c0_232 = arith.constant 0 : index
    %473 = vector.load %arg2[%c1_230, %c0_231, %c0_232] : memref<8x8x128xf32, #tpu.memory_space<vmem>>, vector<1x8x128xf32>
    %474 = vector.shape_cast %473 : vector<1x8x128xf32> to vector<8x128xf32>
    %c0_233 = arith.constant 0 : index
    %c0_234 = arith.constant 0 : index
    %475 = vector.load %arg11[%c0_233, %c0_234] : memref<8x32xf32, #tpu.memory_space<vmem>>, vector<8x32xf32>
    %c0_235 = arith.constant 0 : index
    %c0_236 = arith.constant 0 : index
    %476 = vector.load %arg12[%c0_235, %c0_236] : memref<8x32xf32, #tpu.memory_space<vmem>>, vector<8x32xf32>
    %cst_237 = arith.constant dense<0.000000e+00> : vector<8x128xf32>
    %477 = tpu.matmul %475, %4, %cst_237 {dimension_numbers = #tpu.dot_dimension_numbers<[1], [0], [0], [1], [0, 0, 1, 1], [], []>} : vector<8x32xf32>, vector<32x128xf32>, vector<8x128xf32> -> vector<8x128xf32>
    %478 = arith.addf %474, %477 : vector<8x128xf32>
    %479 = vector.extract_strided_slice %478 {offsets = [0, 0], sizes = [8, 32], strides = [1, 1]} : vector<8x128xf32> to vector<8x32xf32>
    %480 = arith.negf %479 : vector<8x32xf32>
    %481 = math.exp %480 : vector<8x32xf32>
    %cst_238 = arith.constant 1.000000e+00 : f32
    %482 = vector.broadcast %cst_238 : f32 to vector<8x32xf32>
    %483 = arith.addf %482, %481 : vector<8x32xf32>
    %484 = arith.divf %482, %483 : vector<8x32xf32>
    %485 = vector.extract_strided_slice %478 {offsets = [0, 32], sizes = [8, 32], strides = [1, 1]} : vector<8x128xf32> to vector<8x32xf32>
    %486 = arith.negf %485 : vector<8x32xf32>
    %487 = math.exp %486 : vector<8x32xf32>
    %cst_239 = arith.constant 1.000000e+00 : f32
    %488 = vector.broadcast %cst_239 : f32 to vector<8x32xf32>
    %489 = arith.addf %488, %487 : vector<8x32xf32>
    %490 = arith.divf %488, %489 : vector<8x32xf32>
    %491 = vector.extract_strided_slice %478 {offsets = [0, 64], sizes = [8, 32], strides = [1, 1]} : vector<8x128xf32> to vector<8x32xf32>
    %492 = math.tanh %491 : vector<8x32xf32>
    %493 = vector.extract_strided_slice %478 {offsets = [0, 96], sizes = [8, 32], strides = [1, 1]} : vector<8x128xf32> to vector<8x32xf32>
    %494 = arith.negf %493 : vector<8x32xf32>
    %495 = math.exp %494 : vector<8x32xf32>
    %cst_240 = arith.constant 1.000000e+00 : f32
    %496 = vector.broadcast %cst_240 : f32 to vector<8x32xf32>
    %497 = arith.addf %496, %495 : vector<8x32xf32>
    %498 = arith.divf %496, %497 : vector<8x32xf32>
    %499 = arith.mulf %490, %476 : vector<8x32xf32>
    %500 = arith.mulf %484, %492 : vector<8x32xf32>
    %501 = arith.addf %499, %500 : vector<8x32xf32>
    %502 = math.tanh %501 : vector<8x32xf32>
    %503 = arith.mulf %498, %502 : vector<8x32xf32>
    %c0_241 = arith.constant 0 : index
    %c0_242 = arith.constant 0 : index
    %504 = vector.load %arg11[%c0_241, %c0_242] : memref<8x32xf32, #tpu.memory_space<vmem>>, vector<8x32xf32>
    tpu.vector_store %arg11[%c0_241, %c0_242], %503 {strides = array<i32>} : memref<8x32xf32, #tpu.memory_space<vmem>>, vector<8x32xf32>,
    %c0_243 = arith.constant 0 : index
    %c0_244 = arith.constant 0 : index
    %505 = vector.load %arg12[%c0_243, %c0_244] : memref<8x32xf32, #tpu.memory_space<vmem>>, vector<8x32xf32>
    tpu.vector_store %arg12[%c0_243, %c0_244], %501 {strides = array<i32>} : memref<8x32xf32, #tpu.memory_space<vmem>>, vector<8x32xf32>,
    %c1_245 = arith.constant 1 : index
    %c0_246 = arith.constant 0 : index
    %c0_247 = arith.constant 0 : index
    %506 = vector.load %arg6[%c1_245, %c0_246, %c0_247] : memref<8x8x32xf32, #tpu.memory_space<vmem>>, vector<1x8x32xf32>
    %507 = vector.shape_cast %506 : vector<1x8x32xf32> to vector<8x32xf32>
    %508 = vector.shape_cast %503 : vector<8x32xf32> to vector<1x8x32xf32>
    tpu.vector_store %arg6[%c1_245, %c0_246, %c0_247], %508 {strides = array<i32>} : memref<8x8x32xf32, #tpu.memory_space<vmem>>, vector<1x8x32xf32>,
    %c7_248 = arith.constant 7 : index
    %c0_249 = arith.constant 0 : index
    %c0_250 = arith.constant 0 : index
    %509 = vector.load %arg1[%c7_248, %c0_249, %c0_250] : memref<8x8x128xf32, #tpu.memory_space<vmem>>, vector<1x8x128xf32>
    %510 = vector.shape_cast %509 : vector<1x8x128xf32> to vector<8x128xf32>
    %c0_251 = arith.constant 0 : index
    %c0_252 = arith.constant 0 : index
    %511 = vector.load %arg9[%c0_251, %c0_252] : memref<8x32xf32, #tpu.memory_space<vmem>>, vector<8x32xf32>
    %c0_253 = arith.constant 0 : index
    %c0_254 = arith.constant 0 : index
    %512 = vector.load %arg10[%c0_253, %c0_254] : memref<8x32xf32, #tpu.memory_space<vmem>>, vector<8x32xf32>
    %cst_255 = arith.constant dense<0.000000e+00> : vector<8x128xf32>
    %513 = tpu.matmul %511, %3, %cst_255 {dimension_numbers = #tpu.dot_dimension_numbers<[1], [0], [0], [1], [0, 0, 1, 1], [], []>} : vector<8x32xf32>, vector<32x128xf32>, vector<8x128xf32> -> vector<8x128xf32>
    %514 = arith.addf %510, %513 : vector<8x128xf32>
    %515 = vector.extract_strided_slice %514 {offsets = [0, 0], sizes = [8, 32], strides = [1, 1]} : vector<8x128xf32> to vector<8x32xf32>
    %516 = arith.negf %515 : vector<8x32xf32>
    %517 = math.exp %516 : vector<8x32xf32>
    %cst_256 = arith.constant 1.000000e+00 : f32
    %518 = vector.broadcast %cst_256 : f32 to vector<8x32xf32>
    %519 = arith.addf %518, %517 : vector<8x32xf32>
    %520 = arith.divf %518, %519 : vector<8x32xf32>
    %521 = vector.extract_strided_slice %514 {offsets = [0, 32], sizes = [8, 32], strides = [1, 1]} : vector<8x128xf32> to vector<8x32xf32>
    %522 = arith.negf %521 : vector<8x32xf32>
    %523 = math.exp %522 : vector<8x32xf32>
    %cst_257 = arith.constant 1.000000e+00 : f32
    %524 = vector.broadcast %cst_257 : f32 to vector<8x32xf32>
    %525 = arith.addf %524, %523 : vector<8x32xf32>
    %526 = arith.divf %524, %525 : vector<8x32xf32>
    %527 = vector.extract_strided_slice %514 {offsets = [0, 64], sizes = [8, 32], strides = [1, 1]} : vector<8x128xf32> to vector<8x32xf32>
    %528 = math.tanh %527 : vector<8x32xf32>
    %529 = vector.extract_strided_slice %514 {offsets = [0, 96], sizes = [8, 32], strides = [1, 1]} : vector<8x128xf32> to vector<8x32xf32>
    %530 = arith.negf %529 : vector<8x32xf32>
    %531 = math.exp %530 : vector<8x32xf32>
    %cst_258 = arith.constant 1.000000e+00 : f32
    %532 = vector.broadcast %cst_258 : f32 to vector<8x32xf32>
    %533 = arith.addf %532, %531 : vector<8x32xf32>
    %534 = arith.divf %532, %533 : vector<8x32xf32>
    %535 = arith.mulf %526, %512 : vector<8x32xf32>
    %536 = arith.mulf %520, %528 : vector<8x32xf32>
    %537 = arith.addf %535, %536 : vector<8x32xf32>
    %538 = math.tanh %537 : vector<8x32xf32>
    %539 = arith.mulf %534, %538 : vector<8x32xf32>
    %c0_259 = arith.constant 0 : index
    %c0_260 = arith.constant 0 : index
    %540 = vector.load %arg9[%c0_259, %c0_260] : memref<8x32xf32, #tpu.memory_space<vmem>>, vector<8x32xf32>
    tpu.vector_store %arg9[%c0_259, %c0_260], %539 {strides = array<i32>} : memref<8x32xf32, #tpu.memory_space<vmem>>, vector<8x32xf32>,
    %c0_261 = arith.constant 0 : index
    %c0_262 = arith.constant 0 : index
    %541 = vector.load %arg10[%c0_261, %c0_262] : memref<8x32xf32, #tpu.memory_space<vmem>>, vector<8x32xf32>
    tpu.vector_store %arg10[%c0_261, %c0_262], %537 {strides = array<i32>} : memref<8x32xf32, #tpu.memory_space<vmem>>, vector<8x32xf32>,
    %c7_263 = arith.constant 7 : index
    %c0_264 = arith.constant 0 : index
    %c0_265 = arith.constant 0 : index
    %542 = vector.load %arg5[%c7_263, %c0_264, %c0_265] : memref<8x8x32xf32, #tpu.memory_space<vmem>>, vector<1x8x32xf32>
    %543 = vector.shape_cast %542 : vector<1x8x32xf32> to vector<8x32xf32>
    %544 = vector.shape_cast %539 : vector<8x32xf32> to vector<1x8x32xf32>
    tpu.vector_store %arg5[%c7_263, %c0_264, %c0_265], %544 {strides = array<i32>} : memref<8x8x32xf32, #tpu.memory_space<vmem>>, vector<1x8x32xf32>,
    %c0_266 = arith.constant 0 : index
    %c0_267 = arith.constant 0 : index
    %c0_268 = arith.constant 0 : index
    %545 = vector.load %arg2[%c0_266, %c0_267, %c0_268] : memref<8x8x128xf32, #tpu.memory_space<vmem>>, vector<1x8x128xf32>
    %546 = vector.shape_cast %545 : vector<1x8x128xf32> to vector<8x128xf32>
    %c0_269 = arith.constant 0 : index
    %c0_270 = arith.constant 0 : index
    %547 = vector.load %arg11[%c0_269, %c0_270] : memref<8x32xf32, #tpu.memory_space<vmem>>, vector<8x32xf32>
    %c0_271 = arith.constant 0 : index
    %c0_272 = arith.constant 0 : index
    %548 = vector.load %arg12[%c0_271, %c0_272] : memref<8x32xf32, #tpu.memory_space<vmem>>, vector<8x32xf32>
    %cst_273 = arith.constant dense<0.000000e+00> : vector<8x128xf32>
    %549 = tpu.matmul %547, %4, %cst_273 {dimension_numbers = #tpu.dot_dimension_numbers<[1], [0], [0], [1], [0, 0, 1, 1], [], []>} : vector<8x32xf32>, vector<32x128xf32>, vector<8x128xf32> -> vector<8x128xf32>
    %550 = arith.addf %546, %549 : vector<8x128xf32>
    %551 = vector.extract_strided_slice %550 {offsets = [0, 0], sizes = [8, 32], strides = [1, 1]} : vector<8x128xf32> to vector<8x32xf32>
    %552 = arith.negf %551 : vector<8x32xf32>
    %553 = math.exp %552 : vector<8x32xf32>
    %cst_274 = arith.constant 1.000000e+00 : f32
    %554 = vector.broadcast %cst_274 : f32 to vector<8x32xf32>
    %555 = arith.addf %554, %553 : vector<8x32xf32>
    %556 = arith.divf %554, %555 : vector<8x32xf32>
    %557 = vector.extract_strided_slice %550 {offsets = [0, 32], sizes = [8, 32], strides = [1, 1]} : vector<8x128xf32> to vector<8x32xf32>
    %558 = arith.negf %557 : vector<8x32xf32>
    %559 = math.exp %558 : vector<8x32xf32>
    %cst_275 = arith.constant 1.000000e+00 : f32
    %560 = vector.broadcast %cst_275 : f32 to vector<8x32xf32>
    %561 = arith.addf %560, %559 : vector<8x32xf32>
    %562 = arith.divf %560, %561 : vector<8x32xf32>
    %563 = vector.extract_strided_slice %550 {offsets = [0, 64], sizes = [8, 32], strides = [1, 1]} : vector<8x128xf32> to vector<8x32xf32>
    %564 = math.tanh %563 : vector<8x32xf32>
    %565 = vector.extract_strided_slice %550 {offsets = [0, 96], sizes = [8, 32], strides = [1, 1]} : vector<8x128xf32> to vector<8x32xf32>
    %566 = arith.negf %565 : vector<8x32xf32>
    %567 = math.exp %566 : vector<8x32xf32>
    %cst_276 = arith.constant 1.000000e+00 : f32
    %568 = vector.broadcast %cst_276 : f32 to vector<8x32xf32>
    %569 = arith.addf %568, %567 : vector<8x32xf32>
    %570 = arith.divf %568, %569 : vector<8x32xf32>
    %571 = arith.mulf %562, %548 : vector<8x32xf32>
    %572 = arith.mulf %556, %564 : vector<8x32xf32>
    %573 = arith.addf %571, %572 : vector<8x32xf32>
    %574 = math.tanh %573 : vector<8x32xf32>
    %575 = arith.mulf %570, %574 : vector<8x32xf32>
    %c0_277 = arith.constant 0 : index
    %c0_278 = arith.constant 0 : index
    %576 = vector.load %arg11[%c0_277, %c0_278] : memref<8x32xf32, #tpu.memory_space<vmem>>, vector<8x32xf32>
    tpu.vector_store %arg11[%c0_277, %c0_278], %575 {strides = array<i32>} : memref<8x32xf32, #tpu.memory_space<vmem>>, vector<8x32xf32>,
    %c0_279 = arith.constant 0 : index
    %c0_280 = arith.constant 0 : index
    %577 = vector.load %arg12[%c0_279, %c0_280] : memref<8x32xf32, #tpu.memory_space<vmem>>, vector<8x32xf32>
    tpu.vector_store %arg12[%c0_279, %c0_280], %573 {strides = array<i32>} : memref<8x32xf32, #tpu.memory_space<vmem>>, vector<8x32xf32>,
    %c0_281 = arith.constant 0 : index
    %c0_282 = arith.constant 0 : index
    %c0_283 = arith.constant 0 : index
    %578 = vector.load %arg6[%c0_281, %c0_282, %c0_283] : memref<8x8x32xf32, #tpu.memory_space<vmem>>, vector<1x8x32xf32>
    %579 = vector.shape_cast %578 : vector<1x8x32xf32> to vector<8x32xf32>
    %580 = vector.shape_cast %575 : vector<8x32xf32> to vector<1x8x32xf32>
    tpu.vector_store %arg6[%c0_281, %c0_282, %c0_283], %580 {strides = array<i32>} : memref<8x8x32xf32, #tpu.memory_space<vmem>>, vector<1x8x32xf32>,
    %c0_i32_284 = arith.constant 0 : i32
    %581 = arith.cmpi eq, %arg0, %c0_i32_284 : i32
    %582 = arith.extui %581 : i1 to i32
    %c0_i32_285 = arith.constant 0 : i32
    %583 = arith.cmpi ne, %582, %c0_i32_285 : i32
    scf.if %583 {
      %c0_286 = arith.constant 0 : index
      %c0_287 = arith.constant 0 : index
      %584 = vector.load %arg9[%c0_286, %c0_287] : memref<8x32xf32, #tpu.memory_space<vmem>>, vector<8x32xf32>
      %c0_288 = arith.constant 0 : index
      %c0_289 = arith.constant 0 : index
      %c0_290 = arith.constant 0 : index
      %585 = vector.load %arg7[%c0_288, %c0_289, %c0_290] : memref<2x8x32xf32, #tpu.memory_space<vmem>>, vector<1x8x32xf32>
      %586 = vector.shape_cast %585 : vector<1x8x32xf32> to vector<8x32xf32>
      %587 = vector.shape_cast %584 : vector<8x32xf32> to vector<1x8x32xf32>
      tpu.vector_store %arg7[%c0_288, %c0_289, %c0_290], %587 {strides = array<i32>} : memref<2x8x32xf32, #tpu.memory_space<vmem>>, vector<1x8x32xf32>,
      %c0_291 = arith.constant 0 : index
      %c0_292 = arith.constant 0 : index
      %588 = vector.load %arg11[%c0_291, %c0_292] : memref<8x32xf32, #tpu.memory_space<vmem>>, vector<8x32xf32>
      %c1_293 = arith.constant 1 : index
      %c0_294 = arith.constant 0 : index
      %c0_295 = arith.constant 0 : index
      %589 = vector.load %arg7[%c1_293, %c0_294, %c0_295] : memref<2x8x32xf32, #tpu.memory_space<vmem>>, vector<1x8x32xf32>
      %590 = vector.shape_cast %589 : vector<1x8x32xf32> to vector<8x32xf32>
      %591 = vector.shape_cast %588 : vector<8x32xf32> to vector<1x8x32xf32>
      tpu.vector_store %arg7[%c1_293, %c0_294, %c0_295], %591 {strides = array<i32>} : memref<2x8x32xf32, #tpu.memory_space<vmem>>, vector<1x8x32xf32>,
      %c0_296 = arith.constant 0 : index
      %c0_297 = arith.constant 0 : index
      %592 = vector.load %arg10[%c0_296, %c0_297] : memref<8x32xf32, #tpu.memory_space<vmem>>, vector<8x32xf32>
      %c0_298 = arith.constant 0 : index
      %c0_299 = arith.constant 0 : index
      %c0_300 = arith.constant 0 : index
      %593 = vector.load %arg8[%c0_298, %c0_299, %c0_300] : memref<2x8x32xf32, #tpu.memory_space<vmem>>, vector<1x8x32xf32>
      %594 = vector.shape_cast %593 : vector<1x8x32xf32> to vector<8x32xf32>
      %595 = vector.shape_cast %592 : vector<8x32xf32> to vector<1x8x32xf32>
      tpu.vector_store %arg8[%c0_298, %c0_299, %c0_300], %595 {strides = array<i32>} : memref<2x8x32xf32, #tpu.memory_space<vmem>>, vector<1x8x32xf32>,
      %c0_301 = arith.constant 0 : index
      %c0_302 = arith.constant 0 : index
      %596 = vector.load %arg12[%c0_301, %c0_302] : memref<8x32xf32, #tpu.memory_space<vmem>>, vector<8x32xf32>
      %c1_303 = arith.constant 1 : index
      %c0_304 = arith.constant 0 : index
      %c0_305 = arith.constant 0 : index
      %597 = vector.load %arg8[%c1_303, %c0_304, %c0_305] : memref<2x8x32xf32, #tpu.memory_space<vmem>>, vector<1x8x32xf32>
      %598 = vector.shape_cast %597 : vector<1x8x32xf32> to vector<8x32xf32>
      %599 = vector.shape_cast %596 : vector<8x32xf32> to vector<1x8x32xf32>
      tpu.vector_store %arg8[%c1_303, %c0_304, %c0_305], %599 {strides = array<i32>} : memref<2x8x32xf32, #tpu.memory_space<vmem>>, vector<1x8x32xf32>,
    } else {
    }
    return
  }
  func.func @transform_0(%arg0: i32) -> (i32, i32, i32) {
    %c0_i32 = arith.constant 0 : i32
    %c0_i32_0 = arith.constant 0 : i32
    %c0_i32_1 = arith.constant 0 : i32
    return %arg0, %c0_i32, %c0_i32_0 : i32, i32, i32
  }
  func.func @transform_1(%arg0: i32) -> (i32, i32, i32) {
    %c0_i32 = arith.constant 0 : i32
    %0 = arith.subi %c0_i32, %arg0 : i32
    %c0_i32_0 = arith.constant 0 : i32
    %c1_i32 = arith.constant 1 : i32
    %c0_i32_1 = arith.constant 0 : i32
    return %0, %c0_i32_0, %c1_i32 : i32, i32, i32
  }
  func.func @transform_2(%arg0: i32) -> (i32, i32) {
    %c0_i32 = arith.constant 0 : i32
    %c0_i32_0 = arith.constant 0 : i32
    %c0_i32_1 = arith.constant 0 : i32
    return %c0_i32, %c0_i32_0 : i32, i32
  }
  func.func @transform_3(%arg0: i32) -> (i32, i32) {
    %c0_i32 = arith.constant 0 : i32
    %c0_i32_0 = arith.constant 0 : i32
    %c0_i32_1 = arith.constant 0 : i32
    return %c0_i32, %c0_i32_0 : i32, i32
  }
  func.func @transform_4(%arg0: i32) -> (i32, i32, i32) {
    %c0_i32 = arith.constant 0 : i32
    %c0_i32_0 = arith.constant 0 : i32
    %c0_i32_1 = arith.constant 0 : i32
    return %arg0, %c0_i32, %c0_i32_0 : i32, i32, i32
  }
  func.func @transform_5(%arg0: i32) -> (i32, i32, i32) {
    %c0_i32 = arith.constant 0 : i32
    %0 = arith.subi %c0_i32, %arg0 : i32
    %c0_i32_0 = arith.constant 0 : i32
    %c0_i32_1 = arith.constant 0 : i32
    %c0_i32_2 = arith.constant 0 : i32
    return %0, %c0_i32_0, %c0_i32_1 : i32, i32, i32
  }
  func.func @transform_6(%arg0: i32) -> (i32, i32, i32) {
    %c0_i32 = arith.constant 0 : i32
    %c0_i32_0 = arith.constant 0 : i32
    %c0_i32_1 = arith.constant 0 : i32
    %c0_i32_2 = arith.constant 0 : i32
    return %c0_i32, %c0_i32_0, %c0_i32_1 : i32, i32, i32
  }
  func.func @transform_7(%arg0: i32) -> (i32, i32, i32) {
    %c0_i32 = arith.constant 0 : i32
    %c0_i32_0 = arith.constant 0 : i32
    %c0_i32_1 = arith.constant 0 : i32
    %c0_i32_2 = arith.constant 0 : i32
    return %c0_i32, %c0_i32_0, %c0_i32_1 : i32, i32, i32
  }
}

module attributes {stable_mosaic.version = 11 : i64} {
  func.func @_epilogue_kernel(%arg0: i32, %arg1: memref<8x8x32xf32, #tpu.memory_space<vmem>>, %arg2: memref<8x8x32xf32, #tpu.memory_space<vmem>>, %arg3: memref<8x8xf32, #tpu.memory_space<vmem>>, %arg4: memref<8x8x64xf32, #tpu.memory_space<vmem>>) attributes {dimension_semantics = [#tpu.dimension_semantics<parallel>], iteration_bounds = array<i64: 1>, scalar_prefetch = 0 : i64, scratch_operands = 0 : i64, tpu.core_type = #tpu.core_type<tc>, window_params = [{transform_indices = @transform_0, window_bounds = array<i64: 8, 8, 32>}, {transform_indices = @transform_1, window_bounds = array<i64: 8, 8, 32>}, {transform_indices = @transform_2, window_bounds = array<i64: 8, 8>}, {transform_indices = @transform_3, window_bounds = array<i64: 8, 8, 64>}]} {
    %c0 = arith.constant 0 : index
    %c0_0 = arith.constant 0 : index
    %c0_1 = arith.constant 0 : index
    %0 = vector.load %arg1[%c0, %c0_0, %c0_1] : memref<8x8x32xf32, #tpu.memory_space<vmem>>, vector<8x8x32xf32>
    %c0_2 = arith.constant 0 : index
    %c0_3 = arith.constant 0 : index
    %c0_4 = arith.constant 0 : index
    %1 = vector.load %arg2[%c0_2, %c0_3, %c0_4] : memref<8x8x32xf32, #tpu.memory_space<vmem>>, vector<8x8x32xf32>
    %2 = tpu.concatenate %0, %1 in 2 : vector<8x8x32xf32>, vector<8x8x32xf32> -> vector<8x8x64xf32>
    %c0_5 = arith.constant 0 : index
    %c0_6 = arith.constant 0 : index
    %3 = vector.load %arg3[%c0_5, %c0_6] : memref<8x8xf32, #tpu.memory_space<vmem>>, vector<8x8xf32>
    %4 = vector.shape_cast %3 : vector<8x8xf32> to vector<8x8x1xf32>
    %5 = vector.broadcast %4 : vector<8x8x1xf32> to vector<8x8x64xf32>
    %6 = arith.mulf %2, %5 : vector<8x8x64xf32>
    %7 = tpu.transpose %6, [1, 0, 2] : vector<8x8x64xf32> -> vector<8x8x64xf32>
    %c0_7 = arith.constant 0 : index
    %c0_8 = arith.constant 0 : index
    %c0_9 = arith.constant 0 : index
    %8 = vector.load %arg4[%c0_7, %c0_8, %c0_9] : memref<8x8x64xf32, #tpu.memory_space<vmem>>, vector<8x8x64xf32>
    tpu.vector_store %arg4[%c0_7, %c0_8, %c0_9], %7 {strides = array<i32>} : memref<8x8x64xf32, #tpu.memory_space<vmem>>, vector<8x8x64xf32>,
    return
  }
  func.func @transform_0(%arg0: i32) -> (i32, i32, i32) {
    %c0_i32 = arith.constant 0 : i32
    %c0_i32_0 = arith.constant 0 : i32
    %c0_i32_1 = arith.constant 0 : i32
    return %arg0, %c0_i32, %c0_i32_0 : i32, i32, i32
  }
  func.func @transform_1(%arg0: i32) -> (i32, i32, i32) {
    %c0_i32 = arith.constant 0 : i32
    %c0_i32_0 = arith.constant 0 : i32
    %c0_i32_1 = arith.constant 0 : i32
    return %arg0, %c0_i32, %c0_i32_0 : i32, i32, i32
  }
  func.func @transform_2(%arg0: i32) -> (i32, i32) {
    %c0_i32 = arith.constant 0 : i32
    %c0_i32_0 = arith.constant 0 : i32
    return %arg0, %c0_i32 : i32, i32
  }
  func.func @transform_3(%arg0: i32) -> (i32, i32, i32) {
    %c0_i32 = arith.constant 0 : i32
    %c0_i32_0 = arith.constant 0 : i32
    %c0_i32_1 = arith.constant 0 : i32
    return %c0_i32, %arg0, %c0_i32_0 : i32, i32, i32
  }
}

</mosaic_0001>

<bundles_post_ra>
// kernel: _lambda_.5
= control target key start
LH: loop header
LB: loop body
LE: loop exit
PB: predicated region body
PF: predicated region fallthrough
CT: control target
= control target key end

     0   :  { %s288_s16 = smov 32   ;;  %v72_v2 = vlaneseq  ;;  %vm62_vm0 = vcmask 261120   ;;  %v289_v37 = vmov 1983009808   ;;  %v290_v54 = vmov 1934713408   ;;  %s414_s1 = inlined_call_operand.vmem [shape: f32[8,8,32], index: 1, kind: input, shape index: {}]   ;;  %s415_s2 = inlined_call_operand.vmem [shape: f32[8,8], index: 2, kind: input, shape index: {}]   ;;  %s416_s0 = inlined_call_operand.vmem [shape: f32[8,8,32], index: 0, kind: input, shape index: {}]   ;;  %s417_s3 = inlined_call_operand.vmem [shape: f32[8,8,64], index: 3, kind: output, shape index: {}]  }
   0x1   :  { %v24_v0 = vld [vmem:[%s414_s1 + $0x10] sm:$0xff]  ;;  %v22_v1 = vld [vmem:[%s414_s1] sm:$0xff]  ;;  %v25_v3 = vld [vmem:[%s414_s1 + $0x18] sm:$0xff]  ;;  %v139_v38 = vunpack.c.l.s4 %v289_v37  ;;  %v203_v55 = vunpack.c.l.s4 %v290_v54  ;;  %vm272_vm1 = vcmask 523264  }
   0x2   :  { %42 = vrot.lane.b32.xlu1 %v24_v0, %s288_s16  ;;  %38 = vrot.lane.b32.xlu0 %v22_v1, %s288_s16  ;;  %v23_v4 = vld [vmem:[%s414_s1 + $0x8] sm:$0xff]  ;;  %v323_v5 = vshrl.u32 %v72_v2, 7  ;;  %v26_v7 = vld [vmem:[%s414_s1 + $0x20] sm:$0xff] }
   0x3   :  { %v27_v6 = vld [vmem:[%s414_s1 + $0x28] sm:$0xff]  ;;  %v29_v10 = vld [vmem:[%s414_s1 + $0x38] sm:$0xff]  ;;  %v28_v11 = vld [vmem:[%s414_s1 + $0x30] sm:$0xff]  ;;  %v140_v47 = vunpack.c.0.s8 %v139_v38 }
   0x4   :  { %v81_v8 = vsub.s32 1, %v323_v5  ;;  %v74_v9 = vsub.s32 0, %v323_v5  ;;  %v71_v12 = vld [vmem:[%s415_s2] sm:$0xff]  ;;  %v95_v15 = vsub.s32 3, %v323_v5  ;;  %v88_v16 = vsub.s32 2, %v323_v5  ;;  %v17_v39 = vld [vmem:[%s416_s0 + $0x18] sm:$0xff] }
   0x5   :  { %v109_v19 = vsub.s32 5, %v323_v5  ;;  %v102_v20 = vsub.s32 4, %v323_v5  ;;  %v123_v23 = vsub.s32 7, %v323_v5  ;;  %v116_v24 = vsub.s32 6, %v323_v5  ;;  %v16_v40 = vld [vmem:[%s416_s0 + $0x10] sm:$0xff]  ;;  %v15_v41 = vld [vmem:[%s416_s0 + $0x8] sm:$0xff] }
   0x6   :  { %44 = vrot.lane.b32.xlu1 %v25_v3, %s288_s16  ;;  %40 = vrot.lane.b32.xlu0 %v23_v4, %s288_s16  ;;  %v82_v13 = vrot.slane %v71_v12, %v81_v8  ;;  %v75_v14 = vrot.slane %v71_v12, %v74_v9  ;;  %v96_v17 = vrot.slane %v71_v12, %v95_v15  ;;  %v14_v42 = vld [vmem:[%s416_s0] sm:$0xff]  ;;  %v19_v61 = vld [vmem:[%s416_s0 + $0x28] sm:$0xff]  ;;  %v204_v3 = vunpack.c.0.s8 %v203_v55 }
   0x7   :  { %v89_v18 = vrot.slane %v71_v12, %v88_v16  ;;  %v110_v21 = vrot.slane %v71_v12, %v109_v19  ;;  %v103_v22 = vrot.slane %v71_v12, %v102_v20  ;;  %v124_v25 = vrot.slane %v71_v12, %v123_v23  ;;  %v18_v62 = vld [vmem:[%s416_s0 + $0x20] sm:$0xff]  ;;  %v21_v63 = vld [vmem:[%s416_s0 + $0x38] sm:$0xff]  ;;  %v20_v0 = vld [vmem:[%s416_s0 + $0x30] sm:$0xff] }
   0x8   :  { %v117_v26 = vrot.slane %v71_v12, %v116_v24  ;;  %v143_v58 = vsub.s32 %v140_v47, %v323_v5  ;;  %v207_v23 = vsub.s32 %v204_v3, %v323_v5 }
   0xa   :  { %48 = vrot.lane.b32.xlu1 %v27_v6, %s288_s16  ;;  %46 = vrot.lane.b32.xlu0 %v26_v7, %s288_s16 }
   0xe   :  { %52 = vrot.lane.b32.xlu1 %v29_v10, %s288_s16  ;;  %50 = vrot.lane.b32.xlu0 %v28_v11, %s288_s16 }
  0x12   :  { %84 = vbcast.lane.b32.xlu1 %v82_v13, 256  ;;  %77 = vbcast.lane.b32.xlu0 %v75_v14, 256 }
  0x16   :  { %98 = vbcast.lane.b32.xlu1 %v96_v17, 256  ;;  %91 = vbcast.lane.b32.xlu0 %v89_v18, 256 }
  0x1a   :  { %112 = vbcast.lane.b32.xlu1 %v110_v21, 256  ;;  %105 = vbcast.lane.b32.xlu0 %v103_v22, 256 }
  0x1e   :  { %126 = vbcast.lane.b32.xlu1 %v124_v25, 256  ;;  %119 = vbcast.lane.b32.xlu0 %v117_v26, 256 }
  0x74   :  { %v43_v27 = vpop.permute.xlu1 %42  ;;  %v39_v28 = vpop.permute.xlu0 %38 }
  0x75   :  { %v65_v46 = vsel %vm62_vm0, %v16_v40, %v43_v27  ;;  %v63_v51 = vsel %vm62_vm0, %v14_v42, %v39_v28 }
  0x78   :  { %v45_v29 = vpop.permute.xlu1 %44  ;;  %v41_v30 = vpop.permute.xlu0 %40 }
  0x79   :  { %v66_v44 = vsel %vm62_vm0, %v17_v39, %v45_v29  ;;  %v64_v50 = vsel %vm62_vm0, %v15_v41, %v41_v30 }
  0x7c   :  { %v49_v31 = vpop.permute.xlu1 %48  ;;  %v47_v32 = vpop.permute.xlu0 %46 }
  0x7d   :  { %v68_v4 = vsel %vm62_vm0, %v19_v61, %v49_v31  ;;  %v67_v6 = vsel %vm62_vm0, %v18_v62, %v47_v32 }
  0x80   :  { %v53_v33 = vpop.permute.xlu1 %52  ;;  %v51_v34 = vpop.permute.xlu0 %50 }
  0x81   :  { %v70_v11 = vsel %vm62_vm0, %v21_v63, %v53_v33  ;;  %v69_v12 = vsel %vm62_vm0, %v20_v0, %v51_v34 }
  0x84   :  { %v85_v35 = vpop.permute.xlu1 %84  ;;  %v78_v36 = vpop.permute.xlu0 %77 }
  0x85   :  { %v129_v52 = vmul.f32 %v85_v35, %v64_v50  ;;  %v128_v53 = vmul.f32 %v78_v36, %v63_v51 }
  0x88   :  { %v99_v43 = vpop.permute.xlu1 %98  ;;  %v92_v45 = vpop.permute.xlu0 %91 }
  0x89   :  { %v131_v48 = vmul.f32 %v99_v43, %v66_v44  ;;  %v130_v49 = vmul.f32 %v92_v45, %v65_v46 }
  0x8b   :  { %v152_v59 = vcombine.low %v129_v52, %v131_v48  ;;  %v136_v60 = vcombine.low %v128_v53, %v130_v49  ;;  %v153_v1 = vcombine.high %v129_v52, %v131_v48  ;;  %v137_v2 = vcombine.high %v128_v53, %v130_v49 }
  0x8c   :  { %v113_v56 = vpop.permute.xlu1 %112  ;;  %v106_v57 = vpop.permute.xlu0 %105 }
  0x8d   :  { %v160_v9 = vrot.slane %v152_v59, %v143_v58  ;;  %v144_v10 = vrot.slane %v136_v60, %v143_v58  ;;  %v133_v13 = vmul.f32 %v113_v56, %v68_v4  ;;  %v132_v14 = vmul.f32 %v106_v57, %v67_v6 }
  0x8e   :  { %v167_v17 = vrot.slane %v153_v1, %v143_v58  ;;  %v151_v18 = vrot.slane %v137_v2, %v143_v58 }
  0x8f   :  { %v200_v24 = vcombine.low %v144_v10, %v160_v9  ;;  %v201_v25 = vcombine.high %v144_v10, %v160_v9 }
  0x90   :  { %v127_v7 = vpop.permute.xlu1 %126  ;;  %v120_v8 = vpop.permute.xlu0 %119  ;;  %v216_v30 = vcombine.low %v151_v18, %v167_v17  ;;  %v217_v31 = vcombine.high %v151_v18, %v167_v17 }
  0x91   :  { %v135_v15 = vmul.f32 %v127_v7, %v70_v11  ;;  %v134_v16 = vmul.f32 %v120_v8, %v69_v12  ;;  %v208_v36 = vrot.slane %v200_v24, %v207_v23  ;;  %v215_v37 = vrot.slane %v201_v25, %v207_v23 }
  0x92   :  { %v224_v42 = vrot.slane %v216_v30, %v207_v23  ;;  %v231_v5 = vrot.slane %v217_v31, %v207_v23 }
  0x93   :  { %v184_v19 = vcombine.low %v133_v13, %v135_v15  ;;  %v185_v20 = vcombine.high %v133_v13, %v135_v15  ;;  %v168_v21 = vcombine.low %v132_v14, %v134_v16  ;;  %v169_v22 = vcombine.high %v132_v14, %v134_v16 }
  0x95   :  { %v192_v26 = vrot.slane %v184_v19, %v143_v58  ;;  %v199_v27 = vrot.slane %v185_v20, %v143_v58  ;;  %v176_v28 = vrot.slane %v168_v21, %v143_v58  ;;  %v183_v29 = vrot.slane %v169_v22, %v143_v58 }
  0x97   :  { %v232_v32 = vcombine.low %v176_v28, %v192_v26  ;;  %v233_v33 = vcombine.high %v176_v28, %v192_v26  ;;  %v248_v34 = vcombine.low %v183_v29, %v199_v27  ;;  %v249_v35 = vcombine.high %v183_v29, %v199_v27 }
  0x99   :  { %v240_v38 = vrot.slane %v232_v32, %v207_v23  ;;  %v247_v39 = vrot.slane %v233_v33, %v207_v23  ;;  %v256_v40 = vrot.slane %v248_v34, %v207_v23  ;;  %v263_v41 = vrot.slane %v249_v35, %v207_v23 }
  0x9b   :  { %v264_v43 = vcombine.low %v208_v36, %v240_v38  ;;  %v265_v44 = vcombine.high %v208_v36, %v240_v38  ;;  %v266_v45 = vcombine.low %v215_v37, %v247_v39  ;;  %v267_v46 = vcombine.high %v215_v37, %v247_v39 }
  0x9c   :  { %v268_v47 = vcombine.low %v224_v42, %v256_v40  ;;  %v269_v48 = vcombine.high %v224_v42, %v256_v40  ;;  %v270_v49 = vcombine.low %v231_v5, %v263_v41  ;;  %v271_v50 = vcombine.high %v231_v5, %v263_v41 }
  0x9d   :  { %273 = vst.msk [vmem:[%s417_s3] sm:$0xff] %vm272_vm1, %v264_v43  ;;  %274 = vst.msk [vmem:[%s417_s3 + $0x8] sm:$0xff] %vm272_vm1, %v265_v44 }
  0x9e   :  { %275 = vst.msk [vmem:[%s417_s3 + $0x10] sm:$0xff] %vm272_vm1, %v266_v45  ;;  %276 = vst.msk [vmem:[%s417_s3 + $0x18] sm:$0xff] %vm272_vm1, %v267_v46 }
  0x9f   :  { %277 = vst.msk [vmem:[%s417_s3 + $0x20] sm:$0xff] %vm272_vm1, %v268_v47  ;;  %278 = vst.msk [vmem:[%s417_s3 + $0x28] sm:$0xff] %vm272_vm1, %v269_v48 }
  0xa0   :  { %279 = vst.msk [vmem:[%s417_s3 + $0x30] sm:$0xff] %vm272_vm1, %v270_v49  ;;  %280 = vst.msk [vmem:[%s417_s3 + $0x38] sm:$0xff] %vm272_vm1, %v271_v50 }

// kernel: _lambda_.3
= control target key start
LH: loop header
LB: loop body
LE: loop exit
PB: predicated region body
PF: predicated region fallthrough
CT: control target
= control target key end

     0   :  { %vm173_vm0 = vcmask 261120   ;;  %v2587_v2 = vmov 0.0   ;;  %vm2588_vm1 = vmmov 0   ;;  %s2589_s17 = smov 32   ;;  %s2590_s22 = smov 64   ;;  %s3128_s0 = inlined_call_operand.vmem [shape: f32[8,8,256], index: 0, kind: input, shape index: {}, may-alias: {0,1}]   ;;  %s3129_s1 = inlined_call_operand.vmem [shape: f32[8,8,256], index: 1, kind: input, shape index: {}, may-alias: {0,1}]   ;;  %s3130_s2 = inlined_call_operand.vmem [shape: f32[32,128], index: 2, kind: input, shape index: {}]   ;;  %s3131_s3 = inlined_call_operand.vmem [shape: f32[32,128], index: 3, kind: input, shape index: {}]   ;;  %s3132_s4 = inlined_call_operand.vmem [shape: f32[8,8,32], index: 4, kind: output, shape index: {0}]   ;;  %s3133_s5 = inlined_call_operand.vmem [shape: f32[8,8,32], index: 5, kind: output, shape index: {1}]   ;;  %s3134_s6 = inlined_call_operand.vmem [shape: f32[2,8,32], index: 6, kind: output, shape index: {2}]   ;;  %s3135_s7 = inlined_call_operand.vmem [shape: f32[2,8,32], index: 7, kind: output, shape index: {3}]  }
   0x1   :  { %v2635_v0 = vld [vmem:[%s3130_s2 + $0x18] sm:$0xff]  ;;  %2270 = vmatprep.subr.mxu0 %v2587_v2  ;;  %2281 = vmatprep.subr.mxu1 %v2587_v2  ;;  %v2647_v3 = vld [vmem:[%s3130_s2 + $0x10] sm:$0xff]  ;;  %174 = vst.msk [vmem:[#allocation2] sm:$0xff] %vm173_vm0, %v2587_v2  ;;  %175 = vst.msk [vmem:[#allocation3] sm:$0xff] %vm173_vm0, %v2587_v2  ;;  %s2591_s23 = smov 96  }
   0x2   :  { %v2640_v1 = vld [vmem:[%s3131_s3 + $0x18] sm:$0xff]  ;;  %v2652_v4 = vld [vmem:[%s3131_s3 + $0x10] sm:$0xff]  ;;  %176 = vst.msk [vmem:[#allocation4] sm:$0xff] %vm173_vm0, %v2587_v2  ;;  %177 = vst.msk [vmem:[#allocation5] sm:$0xff] %vm173_vm0, %v2587_v2  ;;  %2271 = vmatpush3.msra.mxu0 %v2635_v0  ;;  %2278 = vmatprep.mubr.msk.f32.mxu0 %vm2588_vm1, %v2587_v2 }
   0x3   :  { %2282 = vmatpush3.msra.mxu1 %v2640_v1  ;;  %2272 = vmatprep.subr.mxu0 %v2587_v2  ;;  %v2669_v5 = vld [vmem:[%s3130_s2 + $0x8] sm:$0xff]  ;;  %v2683_v7 = vld [vmem:[%s3130_s2] sm:$0xff]  ;;  %v2141_v15 = vld [vmem:[%s3129_s1 + $0x78] sm:$0xff] }
   0x4   :  { %2283 = vmatprep.subr.mxu1 %v2587_v2  ;;  %2273 = vmatpush3.msra.mxu0 %v2647_v3  ;;  %v2676_v6 = vld [vmem:[%s3131_s3 + $0x8] sm:$0xff]  ;;  %v2691_v8 = vld [vmem:[%s3131_s3] sm:$0xff]  ;;  %v59_v55 = vld [vmem:[%s3128_s0 + $0x10] sm:$0xff] }
   0x5   :  { %2284 = vmatpush3.msra.mxu1 %v2652_v4  ;;  %2274 = vmatprep.subr.mxu0 %v2587_v2  ;;  %v57_v13 = vld [vmem:[%s3128_s0] sm:$0xff]  ;;  %v2140_v59 = vld [vmem:[%s3129_s1 + $0x68] sm:$0xff] }
   0x6   :  { %2285 = vmatprep.subr.mxu1 %v2587_v2  ;;  %2275 = vmatpush3.msra.mxu0 %v2669_v5 }
   0x7   :  { %2276 = vmatprep.subr.mxu0 %v2587_v2  ;;  %2286 = vmatpush3.msra.mxu1 %v2676_v6 }
   0x8   :  { %2277 = vmatpush3.msra.mxu0 %v2683_v7  ;;  %v187_v9 = vld [vmem:[#allocation2] sm:$0xff]  ;;  %2287 = vmatprep.subr.mxu1 %v2587_v2  ;;  %v188_v11 = vld [vmem:[#allocation3] sm:$0xff] }
   0x9   :  { %v305_v10 = vld [vmem:[#allocation4] sm:$0xff]  ;;  %2279 = vmatmul.mubr.msk.f32.vlgmr.msra.gmra.mxu0 %vm173_vm0, %v187_v9  ;;  %2288 = vmatpush3.msra.mxu1 %v2691_v8  ;;  %v306_v12 = vld [vmem:[#allocation5] sm:$0xff] }
   0xa   :  { %2289 = vmatprep.mubr.msk.f32.mxu1 %vm2588_vm1, %v2587_v2  ;;  %272 = vrot.lane.b32.xlu1 %v188_v11, %s2589_s17 }
   0xb   :  { %2290 = vmatmul.mubr.msk.f32.vlgmr.msra.gmra.mxu1 %vm173_vm0, %v305_v10  ;;  %2292 = vmatprep.subr.mxu0 %v2587_v2 }
   0xc   :  { %2293 = vmatpush3.msra.mxu0 %v2635_v0  ;;  %2303 = vmatprep.subr.mxu1 %v2587_v2 }
   0xd   :  { %2294 = vmatprep.subr.mxu0 %v2587_v2  ;;  %2304 = vmatpush3.msra.mxu1 %v2640_v1 }
   0xe   :  { %389 = vrot.lane.b32.xlu1 %v306_v12, %s2589_s17  ;;  %2295 = vmatpush3.msra.mxu0 %v2647_v3 }
   0xf   :  { %2296 = vmatprep.subr.mxu0 %v2587_v2  ;;  %2305 = vmatprep.subr.mxu1 %v2587_v2 }
  0x10   :  { %2297 = vmatpush3.msra.mxu0 %v2669_v5  ;;  %2300 = vmatprep.mubr.msk.f32.mxu0 %vm2588_vm1, %v2587_v2 }
  0x11   :  { %2298 = vmatprep.subr.mxu0 %v2587_v2  ;;  %2306 = vmatpush3.msra.mxu1 %v2652_v4 }
  0x12   :  { %2299 = vmatpush3.msra.mxu0 %v2683_v7  ;;  %2307 = vmatprep.subr.mxu1 %v2587_v2 }
  0x13   :  { %2308 = vmatpush3.msra.mxu1 %v2676_v6  ;;  %2311 = vmatprep.mubr.msk.f32.mxu1 %vm2588_vm1, %v2587_v2 }
  0x14   :  { %2309 = vmatprep.subr.mxu1 %v2587_v2  ;;  %2314 = vmatprep.subr.mxu0 %v2587_v2 }
  0x15   :  { %2310 = vmatpush3.msra.mxu1 %v2691_v8 }
  0x16   :  { %2325 = vmatprep.subr.mxu1 %v2587_v2 }
  0x7c   :  { %v273_v35 = vpop.permute.xlu1 %272 }
  0x80   :  { %v390_v37 = vpop.permute.xlu1 %389 }
  0xc9   :  { %v259_v14 = vpop.f32.mrf.mxu0 }
  0xca   :  { %v263_v16 = vadd.f32 %v259_v14, %v57_v13 }
  0xcb   :  { %v2280_v17 = vpop.f32.mrf.mxu0  ;;  %v376_v18 = vpop.f32.mrf.mxu1 }
  0xcc   :  { %2451 = vtanh.f32 %v263_v16  ;;  %v380_v19 = vadd.f32 %v2141_v15, %v376_v18  ;;  %v2143_v23 = vmul.f32 -1.442695, %v263_v16 }
  0xcd   :  { %v2291_v20 = vpop.f32.mrf.mxu1 }
  0xce   :  { %2453 = vtanh.f32 %v380_v19  ;;  %v2145_v24 = vmul.f32 -1.442695, %v380_v19 }
  0xcf   :  { %2455 = vpow2.f32 %v2143_v23 }
  0xd0   :  { %2457 = vpow2.f32 %v2145_v24 }
  0xd9   :  { %v2452_v21 = vpop.eup %2451 }
  0xda   :  { %277 = vrot.lane.b32.xlu0 %v2452_v21, %s2590_s22 }
  0xdb   :  { %v2454_v22 = vpop.eup %2453 }
  0xdc   :  { %v2456_v25 = vpop.eup %2455 }
  0xdd   :  { %v267_v26 = vadd.f32 1.0, %v2456_v25  ;;  %v2458_v27 = vpop.eup %2457 }
  0xde   :  { %394 = vrot.lane.b32.xlu0 %v2454_v22, %s2590_s22  ;;  %v384_v28 = vadd.f32 1.0, %v2458_v27 }
  0xdf   :  { %2459 = vrcp.f32 %v267_v26 }
  0xe0   :  { %2461 = vrcp.f32 %v384_v28 }
  0xec   :  { %v2460_v29 = vpop.eup %2459 }
  0xed   :  { %v2462_v32 = vpop.eup %2461  ;;  %v275_v36 = vmul.f32 %v2460_v29, %v273_v35 }
  0xee   :  { %v392_v40 = vmul.f32 %v2462_v32, %v390_v37 }
 0x14c   :  { %v278_v30 = vpop.permute.xlu0 %277 }
 0x14d   :  { %v280_v31 = vmul.f32 %v2460_v29, %v278_v30 }
 0x14f   :  { %282 = vrot.lane.b32.xlu0 %v280_v31, %s2589_s17 }
 0x150   :  { %v395_v33 = vpop.permute.xlu0 %394 }
 0x151   :  { %v397_v34 = vmul.f32 %v2462_v32, %v395_v33 }
 0x153   :  { %399 = vrot.lane.b32.xlu1 %v397_v34, %s2589_s17 }
 0x1c1   :  { %v283_v38 = vpop.permute.xlu0 %282 }
 0x1c2   :  { %v285_v39 = vadd.f32 %v283_v38, %v275_v36 }
 0x1c4   :  { %2463 = vtanh.f32 %v285_v39 }
 0x1c5   :  { %v400_v41 = vpop.permute.xlu1 %399 }
 0x1c6   :  { %v402_v42 = vadd.f32 %v400_v41, %v392_v40 }
 0x1c8   :  { %2465 = vtanh.f32 %v402_v42 }
 0x1d1   :  { %v2464_v43 = vpop.eup %2463 }
 0x1d2   :  { %288 = vrot.lane.b32.xlu0 %v2464_v43, %s2590_s22 }
 0x1d5   :  { %v2466_v44 = vpop.eup %2465 }
 0x1d6   :  { %405 = vrot.lane.b32.xlu1 %v2466_v44, %s2590_s22  ;;  %v61_v44 = vld [vmem:[%s3128_s0 + $0x20] sm:$0xff] }
 0x244   :  { %v289_v45 = vpop.permute.xlu0 %288 }
 0x245   :  { %v291_v46 = vmul.f32 %v2460_v29, %v289_v45 }
 0x247   :  { %293 = vrot.lane.b32.xlu0 %v291_v46, %s2589_s17 }
 0x248   :  { %v406_v47 = vpop.permute.xlu1 %405 }
 0x249   :  { %v408_v48 = vmul.f32 %v2462_v32, %v406_v47 }
 0x24b   :  { %410 = vrot.lane.b32.xlu1 %v408_v48, %s2589_s17  ;;  %298 = vrot.lane.b32.xlu0 %v285_v39, %s2591_s23  ;;  %v2139_v48 = vld [vmem:[%s3129_s1 + $0x58] sm:$0xff] }
 0x24f   :  { %415 = vrot.lane.b32.xlu1 %v402_v42, %s2591_s23 }
 0x2b9   :  { %v294_v49 = vpop.permute.xlu0 %293 }
 0x2ba   :  { %296 = vst.msk [vmem:[#allocation2] sm:$0xff] %vm173_vm0, %v294_v49  ;;  %302 = vst.msk [vmem:[%s3132_s4] sm:$0xff] %vm173_vm0, %v294_v49 }
 0x2bd   :  { %v411_v50 = vpop.permute.xlu1 %410  ;;  %v299_v51 = vpop.permute.xlu0 %298 }
 0x2be   :  { %413 = vst.msk [vmem:[#allocation4] sm:$0xff] %vm173_vm0, %v411_v50  ;;  %2146 = vst.msk [vmem:[%s3133_s5 + $0x38] sm:$0xff] %vm173_vm0, %v411_v50 }
 0x2bf   :  { %301 = vst.msk [vmem:[#allocation3] sm:$0xff] %vm173_vm0, %v299_v51 }
 0x2c1   :  { %v416_v52 = vpop.permute.xlu1 %415  ;;  %v423_v53 = vld [vmem:[#allocation2] sm:$0xff] }
 0x2c2   :  { %418 = vst.msk [vmem:[#allocation5] sm:$0xff] %vm173_vm0, %v416_v52  ;;  %2301 = vmatmul.mubr.msk.f32.vlgmr.msra.gmra.mxu0 %vm173_vm0, %v423_v53 }
 0x2c3   :  { %2315 = vmatpush3.msra.mxu0 %v2635_v0  ;;  %2322 = vmatprep.mubr.msk.f32.mxu0 %vm2588_vm1, %v2587_v2 }
 0x2c4   :  { %2316 = vmatprep.subr.mxu0 %v2587_v2 }
 0x2c5   :  { %v541_v54 = vld [vmem:[#allocation4] sm:$0xff]  ;;  %2317 = vmatpush3.msra.mxu0 %v2647_v3 }
 0x2c6   :  { %2312 = vmatmul.mubr.msk.f32.vlgmr.msra.gmra.mxu1 %vm173_vm0, %v541_v54  ;;  %2318 = vmatprep.subr.mxu0 %v2587_v2  ;;  %v424_v10 = vld [vmem:[#allocation3] sm:$0xff] }
 0x2c7   :  { %2319 = vmatpush3.msra.mxu0 %v2669_v5  ;;  %2326 = vmatpush3.msra.mxu1 %v2640_v1 }
 0x2c8   :  { %2320 = vmatprep.subr.mxu0 %v2587_v2  ;;  %2327 = vmatprep.subr.mxu1 %v2587_v2 }
 0x2c9   :  { %2328 = vmatpush3.msra.mxu1 %v2652_v4  ;;  %2321 = vmatpush3.msra.mxu0 %v2683_v7  ;;  %v542_v11 = vld [vmem:[#allocation5] sm:$0xff] }
 0x2ca   :  { %2329 = vmatprep.subr.mxu1 %v2587_v2  ;;  %2333 = vmatprep.mubr.msk.f32.mxu1 %vm2588_vm1, %v2587_v2 }
 0x2cb   :  { %2330 = vmatpush3.msra.mxu1 %v2676_v6  ;;  %2336 = vmatprep.subr.mxu0 %v2587_v2 }
 0x2cc   :  { %2331 = vmatprep.subr.mxu1 %v2587_v2 }
 0x2cd   :  { %2332 = vmatpush3.msra.mxu1 %v2691_v8 }
 0x2ce   :  { %2347 = vmatprep.subr.mxu1 %v2587_v2 }
 0x382   :  { %v494_v56 = vpop.f32.mrf.mxu0 }
 0x383   :  { %v498_v57 = vadd.f32 %v494_v56, %v59_v55 }
 0x384   :  { %v2302_v58 = vpop.f32.mrf.mxu0 }
 0x385   :  { %2467 = vtanh.f32 %v498_v57  ;;  %v2148_v12 = vmul.f32 -1.442695, %v498_v57 }
 0x386   :  { %v612_v60 = vpop.f32.mrf.mxu1 }
 0x387   :  { %v616_v61 = vadd.f32 %v2140_v59, %v612_v60 }
 0x388   :  { %v2313_v62 = vpop.f32.mrf.mxu1 }
 0x389   :  { %2469 = vtanh.f32 %v616_v61  ;;  %v2151_v13 = vmul.f32 -1.442695, %v616_v61 }
 0x38a   :  { %2471 = vpow2.f32 %v2148_v12 }
 0x38b   :  { %2473 = vpow2.f32 %v2151_v13 }
 0x392   :  { %v2468_v63 = vpop.eup %2467 }
 0x393   :  { %512 = vrot.lane.b32.xlu0 %v2468_v63, %s2590_s22 }
 0x396   :  { %v2470_v9 = vpop.eup %2469 }
 0x397   :  { %630 = vrot.lane.b32.xlu1 %v2470_v9, %s2590_s22  ;;  %507 = vrot.lane.b32.xlu0 %v424_v10, %s2589_s17  ;;  %v2472_v14 = vpop.eup %2471 }
 0x398   :  { %v502_v15 = vadd.f32 1.0, %v2472_v14  ;;  %v2474_v16 = vpop.eup %2473 }
 0x399   :  { %v620_v17 = vadd.f32 1.0, %v2474_v16 }
 0x39a   :  { %2475 = vrcp.f32 %v502_v15 }
 0x39b   :  { %625 = vrot.lane.b32.xlu1 %v542_v11, %s2589_s17  ;;  %2477 = vrcp.f32 %v620_v17 }
 0x3a7   :  { %v2476_v18 = vpop.eup %2475 }
 0x3a8   :  { %v2478_v21 = vpop.eup %2477 }
 0x405   :  { %v513_v19 = vpop.permute.xlu0 %512 }
 0x406   :  { %v515_v20 = vmul.f32 %v2476_v18, %v513_v19 }
 0x408   :  { %517 = vrot.lane.b32.xlu0 %v515_v20, %s2589_s17 }
 0x409   :  { %v631_v22 = vpop.permute.xlu1 %630  ;;  %v508_v24 = vpop.permute.xlu0 %507 }
 0x40a   :  { %v633_v23 = vmul.f32 %v2478_v21, %v631_v22  ;;  %v510_v25 = vmul.f32 %v2476_v18, %v508_v24 }
 0x40c   :  { %635 = vrot.lane.b32.xlu1 %v633_v23, %s2589_s17 }
 0x40d   :  { %v626_v26 = vpop.permute.xlu1 %625 }
 0x40e   :  { %v628_v29 = vmul.f32 %v2478_v21, %v626_v26 }
 0x47a   :  { %v518_v27 = vpop.permute.xlu0 %517 }
 0x47b   :  { %v520_v28 = vadd.f32 %v518_v27, %v510_v25 }
 0x47d   :  { %2479 = vtanh.f32 %v520_v28 }
 0x47e   :  { %v636_v30 = vpop.permute.xlu1 %635 }
 0x47f   :  { %v638_v31 = vadd.f32 %v636_v30, %v628_v29 }
 0x481   :  { %2481 = vtanh.f32 %v638_v31 }
 0x48a   :  { %v2480_v32 = vpop.eup %2479 }
 0x48b   :  { %523 = vrot.lane.b32.xlu0 %v2480_v32, %s2590_s22 }
 0x48e   :  { %v2482_v33 = vpop.eup %2481 }
 0x48f   :  { %641 = vrot.lane.b32.xlu1 %v2482_v33, %s2590_s22  ;;  %v63_v33 = vld [vmem:[%s3128_s0 + $0x30] sm:$0xff] }
 0x4fd   :  { %v524_v34 = vpop.permute.xlu0 %523 }
 0x4fe   :  { %v526_v35 = vmul.f32 %v2476_v18, %v524_v34 }
 0x500   :  { %528 = vrot.lane.b32.xlu0 %v526_v35, %s2589_s17 }
 0x501   :  { %v642_v36 = vpop.permute.xlu1 %641 }
 0x502   :  { %v644_v37 = vmul.f32 %v2478_v21, %v642_v36 }
 0x504   :  { %646 = vrot.lane.b32.xlu1 %v644_v37, %s2589_s17  ;;  %533 = vrot.lane.b32.xlu0 %v520_v28, %s2591_s23  ;;  %v2138_v37 = vld [vmem:[%s3129_s1 + $0x48] sm:$0xff] }
 0x508   :  { %651 = vrot.lane.b32.xlu1 %v638_v31, %s2591_s23 }
 0x572   :  { %v529_v38 = vpop.permute.xlu0 %528 }
 0x573   :  { %531 = vst.msk [vmem:[#allocation2] sm:$0xff] %vm173_vm0, %v529_v38  ;;  %2149 = vst.msk [vmem:[%s3132_s4 + $0x8] sm:$0xff] %vm173_vm0, %v529_v38 }
 0x576   :  { %v647_v39 = vpop.permute.xlu1 %646  ;;  %v534_v40 = vpop.permute.xlu0 %533 }
 0x577   :  { %649 = vst.msk [vmem:[#allocation4] sm:$0xff] %vm173_vm0, %v647_v39  ;;  %2152 = vst.msk [vmem:[%s3133_s5 + $0x30] sm:$0xff] %vm173_vm0, %v647_v39 }
 0x578   :  { %536 = vst.msk [vmem:[#allocation3] sm:$0xff] %vm173_vm0, %v534_v40 }
 0x57a   :  { %v652_v41 = vpop.permute.xlu1 %651  ;;  %v659_v42 = vld [vmem:[#allocation2] sm:$0xff] }
 0x57b   :  { %654 = vst.msk [vmem:[#allocation5] sm:$0xff] %vm173_vm0, %v652_v41  ;;  %2323 = vmatmul.mubr.msk.f32.vlgmr.msra.gmra.mxu0 %vm173_vm0, %v659_v42 }
 0x57c   :  { %2337 = vmatpush3.msra.mxu0 %v2635_v0  ;;  %2344 = vmatprep.mubr.msk.f32.mxu0 %vm2588_vm1, %v2587_v2 }
 0x57d   :  { %2338 = vmatprep.subr.mxu0 %v2587_v2 }
 0x57e   :  { %v777_v43 = vld [vmem:[#allocation4] sm:$0xff]  ;;  %2339 = vmatpush3.msra.mxu0 %v2647_v3 }
 0x57f   :  { %2334 = vmatmul.mubr.msk.f32.vlgmr.msra.gmra.mxu1 %vm173_vm0, %v777_v43  ;;  %2340 = vmatprep.subr.mxu0 %v2587_v2  ;;  %v660_v54 = vld [vmem:[#allocation3] sm:$0xff] }
 0x580   :  { %2341 = vmatpush3.msra.mxu0 %v2669_v5  ;;  %2348 = vmatpush3.msra.mxu1 %v2640_v1 }
 0x581   :  { %2342 = vmatprep.subr.mxu0 %v2587_v2  ;;  %2349 = vmatprep.subr.mxu1 %v2587_v2 }
 0x582   :  { %2350 = vmatpush3.msra.mxu1 %v2652_v4  ;;  %2343 = vmatpush3.msra.mxu0 %v2683_v7  ;;  %v778_v55 = vld [vmem:[#allocation5] sm:$0xff] }
 0x583   :  { %2351 = vmatprep.subr.mxu1 %v2587_v2  ;;  %2355 = vmatprep.mubr.msk.f32.mxu1 %vm2588_vm1, %v2587_v2 }
 0x584   :  { %2352 = vmatpush3.msra.mxu1 %v2676_v6  ;;  %2358 = vmatprep.subr.mxu0 %v2587_v2 }
 0x585   :  { %2353 = vmatprep.subr.mxu1 %v2587_v2 }
 0x586   :  { %2354 = vmatpush3.msra.mxu1 %v2691_v8 }
 0x587   :  { %2369 = vmatprep.subr.mxu1 %v2587_v2 }
 0x63b   :  { %v730_v45 = vpop.f32.mrf.mxu0 }
 0x63c   :  { %v734_v46 = vadd.f32 %v730_v45, %v61_v44 }
 0x63d   :  { %v2324_v47 = vpop.f32.mrf.mxu0 }
 0x63e   :  { %2483 = vtanh.f32 %v734_v46  ;;  %v2154_v56 = vmul.f32 -1.442695, %v734_v46 }
 0x63f   :  { %v848_v49 = vpop.f32.mrf.mxu1 }
 0x640   :  { %v852_v50 = vadd.f32 %v2139_v48, %v848_v49 }
 0x641   :  { %v2335_v51 = vpop.f32.mrf.mxu1 }
 0x642   :  { %2485 = vtanh.f32 %v852_v50  ;;  %v2157_v57 = vmul.f32 -1.442695, %v852_v50 }
 0x643   :  { %2487 = vpow2.f32 %v2154_v56 }
 0x644   :  { %2489 = vpow2.f32 %v2157_v57 }
 0x64b   :  { %v2484_v52 = vpop.eup %2483 }
 0x64c   :  { %748 = vrot.lane.b32.xlu0 %v2484_v52, %s2590_s22 }
 0x64f   :  { %v2486_v53 = vpop.eup %2485 }
 0x650   :  { %866 = vrot.lane.b32.xlu1 %v2486_v53, %s2590_s22  ;;  %743 = vrot.lane.b32.xlu0 %v660_v54, %s2589_s17  ;;  %v2488_v58 = vpop.eup %2487 }
 0x651   :  { %v738_v59 = vadd.f32 1.0, %v2488_v58  ;;  %v2490_v60 = vpop.eup %2489 }
 0x652   :  { %v856_v61 = vadd.f32 1.0, %v2490_v60 }
 0x653   :  { %2491 = vrcp.f32 %v738_v59 }
 0x654   :  { %861 = vrot.lane.b32.xlu1 %v778_v55, %s2589_s17  ;;  %2493 = vrcp.f32 %v856_v61 }
 0x660   :  { %v2492_v62 = vpop.eup %2491 }
 0x661   :  { %v2494_v10 = vpop.eup %2493 }
 0x6be   :  { %v749_v63 = vpop.permute.xlu0 %748 }
 0x6bf   :  { %v751_v9 = vmul.f32 %v2492_v62, %v749_v63 }
 0x6c1   :  { %753 = vrot.lane.b32.xlu0 %v751_v9, %s2589_s17 }
 0x6c2   :  { %v867_v11 = vpop.permute.xlu1 %866  ;;  %v744_v13 = vpop.permute.xlu0 %743 }
 0x6c3   :  { %v869_v12 = vmul.f32 %v2494_v10, %v867_v11  ;;  %v746_v14 = vmul.f32 %v2492_v62, %v744_v13 }
 0x6c5   :  { %871 = vrot.lane.b32.xlu1 %v869_v12, %s2589_s17 }
 0x6c6   :  { %v862_v15 = vpop.permute.xlu1 %861 }
 0x6c7   :  { %v864_v18 = vmul.f32 %v2494_v10, %v862_v15 }
 0x733   :  { %v754_v16 = vpop.permute.xlu0 %753 }
 0x734   :  { %v756_v17 = vadd.f32 %v754_v16, %v746_v14 }
 0x736   :  { %2495 = vtanh.f32 %v756_v17 }
 0x737   :  { %v872_v19 = vpop.permute.xlu1 %871 }
 0x738   :  { %v874_v20 = vadd.f32 %v872_v19, %v864_v18 }
 0x73a   :  { %2497 = vtanh.f32 %v874_v20 }
 0x743   :  { %v2496_v21 = vpop.eup %2495 }
 0x744   :  { %759 = vrot.lane.b32.xlu0 %v2496_v21, %s2590_s22 }
 0x747   :  { %v2498_v22 = vpop.eup %2497 }
 0x748   :  { %877 = vrot.lane.b32.xlu1 %v2498_v22, %s2590_s22  ;;  %v65_v22 = vld [vmem:[%s3128_s0 + $0x40] sm:$0xff] }
 0x7b6   :  { %v760_v23 = vpop.permute.xlu0 %759 }
 0x7b7   :  { %v762_v24 = vmul.f32 %v2492_v62, %v760_v23 }
 0x7b9   :  { %764 = vrot.lane.b32.xlu0 %v762_v24, %s2589_s17 }
 0x7ba   :  { %v878_v25 = vpop.permute.xlu1 %877 }
 0x7bb   :  { %v880_v26 = vmul.f32 %v2494_v10, %v878_v25 }
 0x7bd   :  { %882 = vrot.lane.b32.xlu1 %v880_v26, %s2589_s17  ;;  %769 = vrot.lane.b32.xlu0 %v756_v17, %s2591_s23  ;;  %v2137_v26 = vld [vmem:[%s3129_s1 + $0x38] sm:$0xff] }
 0x7c1   :  { %887 = vrot.lane.b32.xlu1 %v874_v20, %s2591_s23 }
 0x82b   :  { %v765_v27 = vpop.permute.xlu0 %764 }
 0x82c   :  { %767 = vst.msk [vmem:[#allocation2] sm:$0xff] %vm173_vm0, %v765_v27  ;;  %2155 = vst.msk [vmem:[%s3132_s4 + $0x10] sm:$0xff] %vm173_vm0, %v765_v27 }
 0x82f   :  { %v883_v28 = vpop.permute.xlu1 %882  ;;  %v770_v29 = vpop.permute.xlu0 %769 }
 0x830   :  { %885 = vst.msk [vmem:[#allocation4] sm:$0xff] %vm173_vm0, %v883_v28  ;;  %2158 = vst.msk [vmem:[%s3133_s5 + $0x28] sm:$0xff] %vm173_vm0, %v883_v28 }
 0x831   :  { %772 = vst.msk [vmem:[#allocation3] sm:$0xff] %vm173_vm0, %v770_v29 }
 0x833   :  { %v888_v30 = vpop.permute.xlu1 %887  ;;  %v895_v31 = vld [vmem:[#allocation2] sm:$0xff] }
 0x834   :  { %890 = vst.msk [vmem:[#allocation5] sm:$0xff] %vm173_vm0, %v888_v30  ;;  %2345 = vmatmul.mubr.msk.f32.vlgmr.msra.gmra.mxu0 %vm173_vm0, %v895_v31 }
 0x835   :  { %2359 = vmatpush3.msra.mxu0 %v2635_v0  ;;  %2366 = vmatprep.mubr.msk.f32.mxu0 %vm2588_vm1, %v2587_v2 }
 0x836   :  { %2360 = vmatprep.subr.mxu0 %v2587_v2 }
 0x837   :  { %v1013_v32 = vld [vmem:[#allocation4] sm:$0xff]  ;;  %2361 = vmatpush3.msra.mxu0 %v2647_v3 }
 0x838   :  { %2356 = vmatmul.mubr.msk.f32.vlgmr.msra.gmra.mxu1 %vm173_vm0, %v1013_v32  ;;  %2362 = vmatprep.subr.mxu0 %v2587_v2  ;;  %v896_v43 = vld [vmem:[#allocation3] sm:$0xff] }
 0x839   :  { %2363 = vmatpush3.msra.mxu0 %v2669_v5  ;;  %2370 = vmatpush3.msra.mxu1 %v2640_v1 }
 0x83a   :  { %2364 = vmatprep.subr.mxu0 %v2587_v2  ;;  %2371 = vmatprep.subr.mxu1 %v2587_v2 }
 0x83b   :  { %2372 = vmatpush3.msra.mxu1 %v2652_v4  ;;  %2365 = vmatpush3.msra.mxu0 %v2683_v7  ;;  %v1014_v44 = vld [vmem:[#allocation5] sm:$0xff] }
 0x83c   :  { %2373 = vmatprep.subr.mxu1 %v2587_v2  ;;  %2377 = vmatprep.mubr.msk.f32.mxu1 %vm2588_vm1, %v2587_v2 }
 0x83d   :  { %2374 = vmatpush3.msra.mxu1 %v2676_v6  ;;  %2380 = vmatprep.subr.mxu0 %v2587_v2 }
 0x83e   :  { %2375 = vmatprep.subr.mxu1 %v2587_v2 }
 0x83f   :  { %2376 = vmatpush3.msra.mxu1 %v2691_v8 }
 0x840   :  { %2391 = vmatprep.subr.mxu1 %v2587_v2 }
 0x8f4   :  { %v966_v34 = vpop.f32.mrf.mxu0 }
 0x8f5   :  { %v970_v35 = vadd.f32 %v966_v34, %v63_v33 }
 0x8f6   :  { %v2346_v36 = vpop.f32.mrf.mxu0 }
 0x8f7   :  { %2499 = vtanh.f32 %v970_v35  ;;  %v2160_v45 = vmul.f32 -1.442695, %v970_v35 }
 0x8f8   :  { %v1084_v38 = vpop.f32.mrf.mxu1 }
 0x8f9   :  { %v1088_v39 = vadd.f32 %v2138_v37, %v1084_v38 }
 0x8fa   :  { %v2357_v40 = vpop.f32.mrf.mxu1 }
 0x8fb   :  { %2501 = vtanh.f32 %v1088_v39  ;;  %v2163_v46 = vmul.f32 -1.442695, %v1088_v39 }
 0x8fc   :  { %2503 = vpow2.f32 %v2160_v45 }
 0x8fd   :  { %2505 = vpow2.f32 %v2163_v46 }
 0x904   :  { %v2500_v41 = vpop.eup %2499 }
 0x905   :  { %984 = vrot.lane.b32.xlu0 %v2500_v41, %s2590_s22 }
 0x908   :  { %v2502_v42 = vpop.eup %2501 }
 0x909   :  { %1102 = vrot.lane.b32.xlu1 %v2502_v42, %s2590_s22  ;;  %979 = vrot.lane.b32.xlu0 %v896_v43, %s2589_s17  ;;  %v2504_v47 = vpop.eup %2503 }
 0x90a   :  { %v974_v48 = vadd.f32 1.0, %v2504_v47  ;;  %v2506_v49 = vpop.eup %2505 }
 0x90b   :  { %v1092_v50 = vadd.f32 1.0, %v2506_v49 }
 0x90c   :  { %2507 = vrcp.f32 %v974_v48 }
 0x90d   :  { %1097 = vrot.lane.b32.xlu1 %v1014_v44, %s2589_s17  ;;  %2509 = vrcp.f32 %v1092_v50 }
 0x919   :  { %v2508_v51 = vpop.eup %2507 }
 0x91a   :  { %v2510_v54 = vpop.eup %2509 }
 0x977   :  { %v985_v52 = vpop.permute.xlu0 %984 }
 0x978   :  { %v987_v53 = vmul.f32 %v2508_v51, %v985_v52 }
 0x97a   :  { %989 = vrot.lane.b32.xlu0 %v987_v53, %s2589_s17 }
 0x97b   :  { %v1103_v55 = vpop.permute.xlu1 %1102  ;;  %v980_v57 = vpop.permute.xlu0 %979 }
 0x97c   :  { %v1105_v56 = vmul.f32 %v2510_v54, %v1103_v55  ;;  %v982_v58 = vmul.f32 %v2508_v51, %v980_v57 }
 0x97e   :  { %1107 = vrot.lane.b32.xlu1 %v1105_v56, %s2589_s17 }
 0x97f   :  { %v1098_v59 = vpop.permute.xlu1 %1097 }
 0x980   :  { %v1100_v62 = vmul.f32 %v2510_v54, %v1098_v59 }
 0x9ec   :  { %v990_v60 = vpop.permute.xlu0 %989 }
 0x9ed   :  { %v992_v61 = vadd.f32 %v990_v60, %v982_v58 }
 0x9ef   :  { %2511 = vtanh.f32 %v992_v61 }
 0x9f0   :  { %v1108_v63 = vpop.permute.xlu1 %1107 }
 0x9f1   :  { %v1110_v9 = vadd.f32 %v1108_v63, %v1100_v62 }
 0x9f3   :  { %2513 = vtanh.f32 %v1110_v9 }
 0x9fc   :  { %v2512_v10 = vpop.eup %2511 }
 0x9fd   :  { %995 = vrot.lane.b32.xlu0 %v2512_v10, %s2590_s22 }
 0xa00   :  { %v2514_v11 = vpop.eup %2513 }
 0xa01   :  { %1113 = vrot.lane.b32.xlu1 %v2514_v11, %s2590_s22 }
 0xa6f   :  { %v996_v12 = vpop.permute.xlu0 %995 }
 0xa70   :  { %v998_v13 = vmul.f32 %v2508_v51, %v996_v12 }
 0xa72   :  { %1000 = vrot.lane.b32.xlu0 %v998_v13, %s2589_s17 }
 0xa73   :  { %v1114_v14 = vpop.permute.xlu1 %1113 }
 0xa74   :  { %v1116_v15 = vmul.f32 %v2510_v54, %v1114_v14 }
 0xa76   :  { %1118 = vrot.lane.b32.xlu1 %v1116_v15, %s2589_s17  ;;  %1005 = vrot.lane.b32.xlu0 %v992_v61, %s2591_s23 }
 0xa7a   :  { %1123 = vrot.lane.b32.xlu1 %v1110_v9, %s2591_s23 }
 0xae4   :  { %v1001_v16 = vpop.permute.xlu0 %1000 }
 0xae5   :  { %1003 = vst.msk [vmem:[#allocation2] sm:$0xff] %vm173_vm0, %v1001_v16  ;;  %2161 = vst.msk [vmem:[%s3132_s4 + $0x18] sm:$0xff] %vm173_vm0, %v1001_v16 }
 0xae8   :  { %v1119_v17 = vpop.permute.xlu1 %1118  ;;  %v1006_v18 = vpop.permute.xlu0 %1005 }
 0xae9   :  { %1121 = vst.msk [vmem:[#allocation4] sm:$0xff] %vm173_vm0, %v1119_v17  ;;  %2164 = vst.msk [vmem:[%s3133_s5 + $0x20] sm:$0xff] %vm173_vm0, %v1119_v17 }
 0xaea   :  { %1008 = vst.msk [vmem:[#allocation3] sm:$0xff] %vm173_vm0, %v1006_v18 }
 0xaec   :  { %v1124_v19 = vpop.permute.xlu1 %1123  ;;  %v1131_v20 = vld [vmem:[#allocation2] sm:$0xff] }
 0xaed   :  { %1126 = vst.msk [vmem:[#allocation5] sm:$0xff] %vm173_vm0, %v1124_v19  ;;  %2367 = vmatmul.mubr.msk.f32.vlgmr.msra.gmra.mxu0 %vm173_vm0, %v1131_v20 }
 0xaee   :  { %2381 = vmatpush3.msra.mxu0 %v2635_v0  ;;  %2388 = vmatprep.mubr.msk.f32.mxu0 %vm2588_vm1, %v2587_v2 }
 0xaef   :  { %2382 = vmatprep.subr.mxu0 %v2587_v2 }
 0xaf0   :  { %v1249_v21 = vld [vmem:[#allocation4] sm:$0xff]  ;;  %2383 = vmatpush3.msra.mxu0 %v2647_v3 }
 0xaf1   :  { %2378 = vmatmul.mubr.msk.f32.vlgmr.msra.gmra.mxu1 %vm173_vm0, %v1249_v21  ;;  %2384 = vmatprep.subr.mxu0 %v2587_v2  ;;  %v1132_v32 = vld [vmem:[#allocation3] sm:$0xff] }
 0xaf2   :  { %2385 = vmatpush3.msra.mxu0 %v2669_v5  ;;  %2392 = vmatpush3.msra.mxu1 %v2640_v1 }
 0xaf3   :  { %2386 = vmatprep.subr.mxu0 %v2587_v2  ;;  %2393 = vmatprep.subr.mxu1 %v2587_v2 }
 0xaf4   :  { %2394 = vmatpush3.msra.mxu1 %v2652_v4  ;;  %2387 = vmatpush3.msra.mxu0 %v2683_v7  ;;  %v1250_v33 = vld [vmem:[#allocation5] sm:$0xff] }
 0xaf5   :  { %2395 = vmatprep.subr.mxu1 %v2587_v2  ;;  %2399 = vmatprep.mubr.msk.f32.mxu1 %vm2588_vm1, %v2587_v2 }
 0xaf6   :  { %2396 = vmatpush3.msra.mxu1 %v2676_v6  ;;  %2402 = vmatprep.subr.mxu0 %v2587_v2 }
 0xaf7   :  { %2397 = vmatprep.subr.mxu1 %v2587_v2 }
 0xaf8   :  { %2398 = vmatpush3.msra.mxu1 %v2691_v8 }
 0xaf9   :  { %2413 = vmatprep.subr.mxu1 %v2587_v2 }
 0xbad   :  { %v1202_v23 = vpop.f32.mrf.mxu0 }
 0xbae   :  { %v1206_v24 = vadd.f32 %v1202_v23, %v65_v22 }
 0xbaf   :  { %v2368_v25 = vpop.f32.mrf.mxu0 }
 0xbb0   :  { %2515 = vtanh.f32 %v1206_v24  ;;  %v2166_v34 = vmul.f32 -1.442695, %v1206_v24 }
 0xbb1   :  { %v1320_v27 = vpop.f32.mrf.mxu1 }
 0xbb2   :  { %v1324_v28 = vadd.f32 %v2137_v26, %v1320_v27 }
 0xbb3   :  { %v2379_v29 = vpop.f32.mrf.mxu1 }
 0xbb4   :  { %2517 = vtanh.f32 %v1324_v28  ;;  %v2169_v35 = vmul.f32 -1.442695, %v1324_v28 }
 0xbb5   :  { %2519 = vpow2.f32 %v2166_v34 }
 0xbb6   :  { %2521 = vpow2.f32 %v2169_v35 }
 0xbbd   :  { %v2516_v30 = vpop.eup %2515 }
 0xbbe   :  { %1220 = vrot.lane.b32.xlu0 %v2516_v30, %s2590_s22 }
 0xbc1   :  { %v2518_v31 = vpop.eup %2517 }
 0xbc2   :  { %1338 = vrot.lane.b32.xlu1 %v2518_v31, %s2590_s22  ;;  %1215 = vrot.lane.b32.xlu0 %v1132_v32, %s2589_s17  ;;  %v2520_v36 = vpop.eup %2519 }
 0xbc3   :  { %v1210_v37 = vadd.f32 1.0, %v2520_v36  ;;  %v2522_v38 = vpop.eup %2521 }
 0xbc4   :  { %v1328_v39 = vadd.f32 1.0, %v2522_v38 }
 0xbc5   :  { %2523 = vrcp.f32 %v1210_v37 }
 0xbc6   :  { %1333 = vrot.lane.b32.xlu1 %v1250_v33, %s2589_s17  ;;  %2525 = vrcp.f32 %v1328_v39 }
 0xbd2   :  { %v2524_v40 = vpop.eup %2523 }
 0xbd3   :  { %v2526_v43 = vpop.eup %2525 }
 0xc30   :  { %v1221_v41 = vpop.permute.xlu0 %1220 }
 0xc31   :  { %v1223_v42 = vmul.f32 %v2524_v40, %v1221_v41 }
 0xc33   :  { %1225 = vrot.lane.b32.xlu0 %v1223_v42, %s2589_s17 }
 0xc34   :  { %v1339_v44 = vpop.permute.xlu1 %1338  ;;  %v1216_v46 = vpop.permute.xlu0 %1215 }
 0xc35   :  { %v1341_v45 = vmul.f32 %v2526_v43, %v1339_v44  ;;  %v1218_v47 = vmul.f32 %v2524_v40, %v1216_v46  ;;  %v2579_v46 = vld [vmem:[%s3130_s2 + $0x18] sm:$0xff] }
 0xc37   :  { %1343 = vrot.lane.b32.xlu1 %v1341_v45, %s2589_s17 }
 0xc38   :  { %v1334_v48 = vpop.permute.xlu1 %1333 }
 0xc39   :  { %v1336_v51 = vmul.f32 %v2526_v43, %v1334_v48  ;;  %v2580_v48 = vld [vmem:[%s3130_s2 + $0x10] sm:$0xff] }
 0xca5   :  { %v1226_v49 = vpop.permute.xlu0 %1225 }
 0xca6   :  { %v1228_v50 = vadd.f32 %v1226_v49, %v1218_v47  ;;  %v2581_v49 = vld [vmem:[%s3130_s2 + $0x8] sm:$0xff] }
 0xca8   :  { %2527 = vtanh.f32 %v1228_v50 }
 0xca9   :  { %v1344_v52 = vpop.permute.xlu1 %1343 }
 0xcaa   :  { %v1346_v53 = vadd.f32 %v1344_v52, %v1336_v51  ;;  %v2583_v51 = vld [vmem:[%s3131_s3 + $0x10] sm:$0xff]  ;;  %v2584_v52 = vld [vmem:[%s3130_s2] sm:$0xff] }
 0xcac   :  { %2529 = vtanh.f32 %v1346_v53 }
 0xcb5   :  { %v2528_v54 = vpop.eup %2527 }
 0xcb6   :  { %1231 = vrot.lane.b32.xlu0 %v2528_v54, %s2590_s22  ;;  %v2586_v54 = vld [vmem:[%s3131_s3] sm:$0xff] }
 0xcb9   :  { %v2530_v55 = vpop.eup %2529 }
 0xcba   :  { %1349 = vrot.lane.b32.xlu1 %v2530_v55, %s2590_s22  ;;  %v69_v55 = vld [vmem:[%s3128_s0 + $0x60] sm:$0xff] }
 0xd28   :  { %v1232_v56 = vpop.permute.xlu0 %1231 }
 0xd29   :  { %v1234_v57 = vmul.f32 %v2524_v40, %v1232_v56 }
 0xd2b   :  { %1236 = vrot.lane.b32.xlu0 %v1234_v57, %s2589_s17 }
 0xd2c   :  { %v1350_v58 = vpop.permute.xlu1 %1349 }
 0xd2d   :  { %v1352_v59 = vmul.f32 %v2526_v43, %v1350_v58 }
 0xd2f   :  { %1354 = vrot.lane.b32.xlu1 %v1352_v59, %s2589_s17  ;;  %1241 = vrot.lane.b32.xlu0 %v1228_v50, %s2591_s23  ;;  %v2582_v50 = vld [vmem:[%s3131_s3 + $0x18] sm:$0xff] }
 0xd30   :  { %v2135_v59 = vld [vmem:[%s3129_s1 + $0x18] sm:$0xff] }
 0xd33   :  { %1359 = vrot.lane.b32.xlu1 %v1346_v53, %s2591_s23  ;;  %v2585_v53 = vld [vmem:[%s3131_s3 + $0x8] sm:$0xff] }
 0xd9d   :  { %v1237_v60 = vpop.permute.xlu0 %1236 }
 0xd9e   :  { %1239 = vst.msk [vmem:[#allocation2] sm:$0xff] %vm173_vm0, %v1237_v60  ;;  %2167 = vst.msk [vmem:[%s3132_s4 + $0x20] sm:$0xff] %vm173_vm0, %v1237_v60 }
 0xda1   :  { %v1355_v61 = vpop.permute.xlu1 %1354  ;;  %v1242_v62 = vpop.permute.xlu0 %1241 }
 0xda2   :  { %1357 = vst.msk [vmem:[#allocation4] sm:$0xff] %vm173_vm0, %v1355_v61  ;;  %2170 = vst.msk [vmem:[%s3133_s5 + $0x18] sm:$0xff] %vm173_vm0, %v1355_v61 }
 0xda3   :  { %1244 = vst.msk [vmem:[#allocation3] sm:$0xff] %vm173_vm0, %v1242_v62 }
 0xda5   :  { %v1360_v63 = vpop.permute.xlu1 %1359  ;;  %v1367_v9 = vld [vmem:[#allocation2] sm:$0xff] }
 0xda6   :  { %1362 = vst.msk [vmem:[#allocation5] sm:$0xff] %vm173_vm0, %v1360_v63  ;;  %2389 = vmatmul.mubr.msk.f32.vlgmr.msra.gmra.mxu0 %vm173_vm0, %v1367_v9 }
 0xda7   :  { %2403 = vmatpush3.msra.mxu0 %v2635_v0  ;;  %2410 = vmatprep.mubr.msk.f32.mxu0 %vm2588_vm1, %v2587_v2  ;;  %v67_v0 = vld [vmem:[%s3128_s0 + $0x50] sm:$0xff] }
 0xda8   :  { %2404 = vmatprep.subr.mxu0 %v2587_v2 }
 0xda9   :  { %v1485_v10 = vld [vmem:[#allocation4] sm:$0xff]  ;;  %2405 = vmatpush3.msra.mxu0 %v2647_v3 }
 0xdaa   :  { %2400 = vmatmul.mubr.msk.f32.vlgmr.msra.gmra.mxu1 %vm173_vm0, %v1485_v10  ;;  %2406 = vmatprep.subr.mxu0 %v2587_v2  ;;  %v1368_v13 = vld [vmem:[#allocation3] sm:$0xff] }
 0xdab   :  { %2407 = vmatpush3.msra.mxu0 %v2669_v5  ;;  %2414 = vmatpush3.msra.mxu1 %v2640_v1  ;;  %v2136_v5 = vld [vmem:[%s3129_s1 + $0x28] sm:$0xff] }
 0xdac   :  { %2408 = vmatprep.subr.mxu0 %v2587_v2  ;;  %2415 = vmatprep.subr.mxu1 %v2587_v2 }
 0xdad   :  { %2416 = vmatpush3.msra.mxu1 %v2652_v4  ;;  %2409 = vmatpush3.msra.mxu0 %v2683_v7  ;;  %v1486_v14 = vld [vmem:[#allocation5] sm:$0xff] }
 0xdae   :  { %2417 = vmatprep.subr.mxu1 %v2587_v2  ;;  %2421 = vmatprep.mubr.msk.f32.mxu1 %vm2588_vm1, %v2587_v2 }
 0xdaf   :  { %2418 = vmatpush3.msra.mxu1 %v2676_v6  ;;  %2424 = vmatprep.subr.mxu0 %v2587_v2 }
 0xdb0   :  { %2419 = vmatprep.subr.mxu1 %v2587_v2 }
 0xdb1   :  { %2420 = vmatpush3.msra.mxu1 %v2691_v8 }
 0xdb2   :  { %2435 = vmatprep.subr.mxu1 %v2587_v2 }
 0xe66   :  { %v1438_v1 = vpop.f32.mrf.mxu0 }
 0xe67   :  { %v1442_v3 = vadd.f32 %v1438_v1, %v67_v0 }
 0xe68   :  { %v2390_v4 = vpop.f32.mrf.mxu0 }
 0xe69   :  { %2531 = vtanh.f32 %v1442_v3  ;;  %v2172_v15 = vmul.f32 -1.442695, %v1442_v3 }
 0xe6a   :  { %v1556_v6 = vpop.f32.mrf.mxu1 }
 0xe6b   :  { %v1560_v7 = vadd.f32 %v2136_v5, %v1556_v6 }
 0xe6c   :  { %v2401_v11 = vpop.f32.mrf.mxu1 }
 0xe6d   :  { %2533 = vtanh.f32 %v1560_v7  ;;  %v2175_v16 = vmul.f32 -1.442695, %v1560_v7 }
 0xe6e   :  { %2535 = vpow2.f32 %v2172_v15 }
 0xe6f   :  { %2537 = vpow2.f32 %v2175_v16 }
 0xe76   :  { %v2532_v12 = vpop.eup %2531 }
 0xe77   :  { %1456 = vrot.lane.b32.xlu0 %v2532_v12, %s2590_s22 }
 0xe7a   :  { %v2534_v8 = vpop.eup %2533 }
 0xe7b   :  { %1574 = vrot.lane.b32.xlu1 %v2534_v8, %s2590_s22  ;;  %1451 = vrot.lane.b32.xlu0 %v1368_v13, %s2589_s17  ;;  %v2536_v17 = vpop.eup %2535 }
 0xe7c   :  { %v1446_v18 = vadd.f32 1.0, %v2536_v17  ;;  %v2538_v19 = vpop.eup %2537 }
 0xe7d   :  { %v1564_v20 = vadd.f32 1.0, %v2538_v19 }
 0xe7e   :  { %2539 = vrcp.f32 %v1446_v18 }
 0xe7f   :  { %1569 = vrot.lane.b32.xlu1 %v1486_v14, %s2589_s17  ;;  %2541 = vrcp.f32 %v1564_v20 }
 0xe8b   :  { %v2540_v21 = vpop.eup %2539 }
 0xe8c   :  { %v2542_v24 = vpop.eup %2541 }
 0xee9   :  { %v1457_v22 = vpop.permute.xlu0 %1456 }
 0xeea   :  { %v1459_v23 = vmul.f32 %v2540_v21, %v1457_v22 }
 0xeec   :  { %1461 = vrot.lane.b32.xlu0 %v1459_v23, %s2589_s17 }
 0xeed   :  { %v1575_v25 = vpop.permute.xlu1 %1574  ;;  %v1452_v27 = vpop.permute.xlu0 %1451 }
 0xeee   :  { %v1577_v26 = vmul.f32 %v2542_v24, %v1575_v25  ;;  %v1454_v28 = vmul.f32 %v2540_v21, %v1452_v27 }
 0xef0   :  { %1579 = vrot.lane.b32.xlu1 %v1577_v26, %s2589_s17 }
 0xef1   :  { %v1570_v29 = vpop.permute.xlu1 %1569 }
 0xef2   :  { %v1572_v32 = vmul.f32 %v2542_v24, %v1570_v29 }
 0xf5e   :  { %v1462_v30 = vpop.permute.xlu0 %1461 }
 0xf5f   :  { %v1464_v31 = vadd.f32 %v1462_v30, %v1454_v28 }
 0xf61   :  { %2543 = vtanh.f32 %v1464_v31 }
 0xf62   :  { %v1580_v33 = vpop.permute.xlu1 %1579 }
 0xf63   :  { %v1582_v34 = vadd.f32 %v1580_v33, %v1572_v32 }
 0xf65   :  { %2545 = vtanh.f32 %v1582_v34 }
 0xf6e   :  { %v2544_v35 = vpop.eup %2543 }
 0xf6f   :  { %1467 = vrot.lane.b32.xlu0 %v2544_v35, %s2590_s22  ;;  %v71_v35 = vld [vmem:[%s3128_s0 + $0x70] sm:$0xff] }
 0xf72   :  { %v2546_v36 = vpop.eup %2545 }
 0xf73   :  { %1585 = vrot.lane.b32.xlu1 %v2546_v36, %s2590_s22 }
 0xfe1   :  { %v1468_v37 = vpop.permute.xlu0 %1467 }
 0xfe2   :  { %v1470_v38 = vmul.f32 %v2540_v21, %v1468_v37 }
 0xfe4   :  { %1472 = vrot.lane.b32.xlu0 %v1470_v38, %s2589_s17 }
 0xfe5   :  { %v1586_v39 = vpop.permute.xlu1 %1585 }
 0xfe6   :  { %v1588_v40 = vmul.f32 %v2542_v24, %v1586_v39  ;;  %v2134_v39 = vld [vmem:[%s3129_s1 + $0x8] sm:$0xff] }
 0xfe8   :  { %1590 = vrot.lane.b32.xlu1 %v1588_v40, %s2589_s17  ;;  %1477 = vrot.lane.b32.xlu0 %v1464_v31, %s2591_s23 }
 0xfec   :  { %1595 = vrot.lane.b32.xlu1 %v1582_v34, %s2591_s23 }
0x1056   :  { %v1473_v41 = vpop.permute.xlu0 %1472 }
0x1057   :  { %1475 = vst.msk [vmem:[#allocation2] sm:$0xff] %vm173_vm0, %v1473_v41  ;;  %2173 = vst.msk [vmem:[%s3132_s4 + $0x28] sm:$0xff] %vm173_vm0, %v1473_v41 }
0x105a   :  { %v1591_v42 = vpop.permute.xlu1 %1590  ;;  %v1478_v43 = vpop.permute.xlu0 %1477 }
0x105b   :  { %1593 = vst.msk [vmem:[#allocation4] sm:$0xff] %vm173_vm0, %v1591_v42  ;;  %2176 = vst.msk [vmem:[%s3133_s5 + $0x10] sm:$0xff] %vm173_vm0, %v1591_v42 }
0x105c   :  { %1480 = vst.msk [vmem:[#allocation3] sm:$0xff] %vm173_vm0, %v1478_v43 }
0x105e   :  { %v1596_v44 = vpop.permute.xlu1 %1595  ;;  %v1603_v45 = vld [vmem:[#allocation2] sm:$0xff] }
0x105f   :  { %1598 = vst.msk [vmem:[#allocation5] sm:$0xff] %vm173_vm0, %v1596_v44  ;;  %2411 = vmatmul.mubr.msk.f32.vlgmr.msra.gmra.mxu0 %vm173_vm0, %v1603_v45 }
0x1060   :  { %2425 = vmatpush3.msra.mxu0 %v2579_v46  ;;  %2432 = vmatprep.mubr.msk.f32.mxu0 %vm2588_vm1, %v2587_v2 }
0x1061   :  { %2426 = vmatprep.subr.mxu0 %v2587_v2 }
0x1062   :  { %v1721_v47 = vld [vmem:[#allocation4] sm:$0xff]  ;;  %2427 = vmatpush3.msra.mxu0 %v2580_v48 }
0x1063   :  { %2422 = vmatmul.mubr.msk.f32.vlgmr.msra.gmra.mxu1 %vm173_vm0, %v1721_v47  ;;  %2428 = vmatprep.subr.mxu0 %v2587_v2  ;;  %v1604_v9 = vld [vmem:[#allocation3] sm:$0xff] }
0x1064   :  { %2429 = vmatpush3.msra.mxu0 %v2581_v49  ;;  %2436 = vmatpush3.msra.mxu1 %v2582_v50 }
0x1065   :  { %2430 = vmatprep.subr.mxu0 %v2587_v2  ;;  %2437 = vmatprep.subr.mxu1 %v2587_v2 }
0x1066   :  { %2438 = vmatpush3.msra.mxu1 %v2583_v51  ;;  %2431 = vmatpush3.msra.mxu0 %v2584_v52  ;;  %v1722_v10 = vld [vmem:[#allocation5] sm:$0xff] }
0x1067   :  { %2439 = vmatprep.subr.mxu1 %v2587_v2  ;;  %2443 = vmatprep.mubr.msk.f32.mxu1 %vm2588_vm1, %v2587_v2 }
0x1068   :  { %2440 = vmatpush3.msra.mxu1 %v2585_v53 }
0x1069   :  { %2441 = vmatprep.subr.mxu1 %v2587_v2 }
0x106a   :  { %2442 = vmatpush3.msra.mxu1 %v2586_v54 }
0x111f   :  { %v1674_v56 = vpop.f32.mrf.mxu0 }
0x1120   :  { %v1678_v57 = vadd.f32 %v1674_v56, %v69_v55 }
0x1121   :  { %v2412_v58 = vpop.f32.mrf.mxu0 }
0x1122   :  { %2547 = vtanh.f32 %v1678_v57  ;;  %v2178_v0 = vmul.f32 -1.442695, %v1678_v57 }
0x1123   :  { %v1792_v60 = vpop.f32.mrf.mxu1 }
0x1124   :  { %v1796_v61 = vadd.f32 %v2135_v59, %v1792_v60 }
0x1125   :  { %v2423_v2 = vpop.f32.mrf.mxu1 }
0x1126   :  { %2549 = vtanh.f32 %v1796_v61  ;;  %v2181_v1 = vmul.f32 -1.442695, %v1796_v61 }
0x1127   :  { %2551 = vpow2.f32 %v2178_v0 }
0x1128   :  { %2553 = vpow2.f32 %v2181_v1 }
0x112f   :  { %v2548_v62 = vpop.eup %2547 }
0x1130   :  { %1692 = vrot.lane.b32.xlu0 %v2548_v62, %s2590_s22 }
0x1133   :  { %v2550_v63 = vpop.eup %2549 }
0x1134   :  { %1810 = vrot.lane.b32.xlu1 %v2550_v63, %s2590_s22  ;;  %1687 = vrot.lane.b32.xlu0 %v1604_v9, %s2589_s17  ;;  %v2552_v3 = vpop.eup %2551 }
0x1135   :  { %v1682_v4 = vadd.f32 1.0, %v2552_v3  ;;  %v2554_v5 = vpop.eup %2553 }
0x1136   :  { %v1800_v6 = vadd.f32 1.0, %v2554_v5 }
0x1137   :  { %2555 = vrcp.f32 %v1682_v4 }
0x1138   :  { %1805 = vrot.lane.b32.xlu1 %v1722_v10, %s2589_s17  ;;  %2557 = vrcp.f32 %v1800_v6 }
0x1144   :  { %v2556_v7 = vpop.eup %2555 }
0x1145   :  { %v2558_v8 = vpop.eup %2557 }
0x11a2   :  { %v1693_v11 = vpop.permute.xlu0 %1692 }
0x11a3   :  { %v1695_v12 = vmul.f32 %v2556_v7, %v1693_v11 }
0x11a5   :  { %1697 = vrot.lane.b32.xlu0 %v1695_v12, %s2589_s17 }
0x11a6   :  { %v1811_v13 = vpop.permute.xlu1 %1810  ;;  %v1688_v15 = vpop.permute.xlu0 %1687 }
0x11a7   :  { %v1813_v14 = vmul.f32 %v2558_v8, %v1811_v13  ;;  %v1690_v16 = vmul.f32 %v2556_v7, %v1688_v15 }
0x11a9   :  { %1815 = vrot.lane.b32.xlu1 %v1813_v14, %s2589_s17 }
0x11aa   :  { %v1806_v17 = vpop.permute.xlu1 %1805 }
0x11ab   :  { %v1808_v20 = vmul.f32 %v2558_v8, %v1806_v17 }
0x1217   :  { %v1698_v18 = vpop.permute.xlu0 %1697 }
0x1218   :  { %v1700_v19 = vadd.f32 %v1698_v18, %v1690_v16 }
0x121a   :  { %2559 = vtanh.f32 %v1700_v19 }
0x121b   :  { %v1816_v21 = vpop.permute.xlu1 %1815 }
0x121c   :  { %v1818_v22 = vadd.f32 %v1816_v21, %v1808_v20 }
0x121e   :  { %2561 = vtanh.f32 %v1818_v22 }
0x1227   :  { %v2560_v23 = vpop.eup %2559 }
0x1228   :  { %1703 = vrot.lane.b32.xlu0 %v2560_v23, %s2590_s22 }
0x122b   :  { %v2562_v24 = vpop.eup %2561 }
0x122c   :  { %1821 = vrot.lane.b32.xlu1 %v2562_v24, %s2590_s22 }
0x129a   :  { %v1704_v25 = vpop.permute.xlu0 %1703 }
0x129b   :  { %v1706_v26 = vmul.f32 %v2556_v7, %v1704_v25 }
0x129d   :  { %1708 = vrot.lane.b32.xlu0 %v1706_v26, %s2589_s17 }
0x129e   :  { %v1822_v27 = vpop.permute.xlu1 %1821 }
0x129f   :  { %v1824_v28 = vmul.f32 %v2558_v8, %v1822_v27 }
0x12a1   :  { %1826 = vrot.lane.b32.xlu1 %v1824_v28, %s2589_s17  ;;  %1713 = vrot.lane.b32.xlu0 %v1700_v19, %s2591_s23 }
0x12a5   :  { %1831 = vrot.lane.b32.xlu1 %v1818_v22, %s2591_s23 }
0x130f   :  { %v1709_v29 = vpop.permute.xlu0 %1708 }
0x1310   :  { %1711 = vst.msk [vmem:[#allocation2] sm:$0xff] %vm173_vm0, %v1709_v29  ;;  %2179 = vst.msk [vmem:[%s3132_s4 + $0x30] sm:$0xff] %vm173_vm0, %v1709_v29 }
0x1313   :  { %v1827_v30 = vpop.permute.xlu1 %1826  ;;  %v1714_v31 = vpop.permute.xlu0 %1713 }
0x1314   :  { %1829 = vst.msk [vmem:[#allocation4] sm:$0xff] %vm173_vm0, %v1827_v30  ;;  %2182 = vst.msk [vmem:[%s3133_s5 + $0x8] sm:$0xff] %vm173_vm0, %v1827_v30 }
0x1315   :  { %1716 = vst.msk [vmem:[#allocation3] sm:$0xff] %vm173_vm0, %v1714_v31 }
0x1317   :  { %v1832_v32 = vpop.permute.xlu1 %1831  ;;  %v1839_v33 = vld [vmem:[#allocation2] sm:$0xff] }
0x1318   :  { %1834 = vst.msk [vmem:[#allocation5] sm:$0xff] %vm173_vm0, %v1832_v32  ;;  %2433 = vmatmul.mubr.msk.f32.vlgmr.msra.gmra.mxu0 %vm173_vm0, %v1839_v33 }
0x131b   :  { %v1956_v34 = vld [vmem:[#allocation4] sm:$0xff] }
0x131c   :  { %2444 = vmatmul.mubr.msk.f32.vlgmr.msra.gmra.mxu1 %vm173_vm0, %v1956_v34  ;;  %v1840_v45 = vld [vmem:[#allocation3] sm:$0xff] }
0x131f   :  { %v1957_v46 = vld [vmem:[#allocation5] sm:$0xff] }
0x13d8   :  { %v1910_v36 = vpop.f32.mrf.mxu0 }
0x13d9   :  { %v1914_v37 = vadd.f32 %v1910_v36, %v71_v35 }
0x13da   :  { %v2434_v38 = vpop.f32.mrf.mxu0 }
0x13db   :  { %2563 = vtanh.f32 %v1914_v37  ;;  %v2184_v47 = vmul.f32 -1.442695, %v1914_v37 }
0x13dc   :  { %v2027_v40 = vpop.f32.mrf.mxu1 }
0x13dd   :  { %v2031_v41 = vadd.f32 %v2134_v39, %v2027_v40 }
0x13de   :  { %v2445_v42 = vpop.f32.mrf.mxu1 }
0x13df   :  { %2565 = vtanh.f32 %v2031_v41  ;;  %v2187_v48 = vmul.f32 -1.442695, %v2031_v41 }
0x13e0   :  { %2567 = vpow2.f32 %v2184_v47 }
0x13e1   :  { %2569 = vpow2.f32 %v2187_v48 }
0x13e8   :  { %v2564_v43 = vpop.eup %2563 }
0x13e9   :  { %1928 = vrot.lane.b32.xlu0 %v2564_v43, %s2590_s22 }
0x13ec   :  { %v2566_v44 = vpop.eup %2565 }
0x13ed   :  { %2045 = vrot.lane.b32.xlu1 %v2566_v44, %s2590_s22  ;;  %1923 = vrot.lane.b32.xlu0 %v1840_v45, %s2589_s17  ;;  %v2568_v49 = vpop.eup %2567 }
0x13ee   :  { %v1918_v50 = vadd.f32 1.0, %v2568_v49  ;;  %v2570_v51 = vpop.eup %2569 }
0x13ef   :  { %v2035_v52 = vadd.f32 1.0, %v2570_v51 }
0x13f0   :  { %2571 = vrcp.f32 %v1918_v50 }
0x13f1   :  { %2040 = vrot.lane.b32.xlu1 %v1957_v46, %s2589_s17  ;;  %2573 = vrcp.f32 %v2035_v52 }
0x13fd   :  { %v2572_v53 = vpop.eup %2571 }
0x13fe   :  { %v2574_v56 = vpop.eup %2573 }
0x145b   :  { %v1929_v54 = vpop.permute.xlu0 %1928 }
0x145c   :  { %v1931_v55 = vmul.f32 %v2572_v53, %v1929_v54 }
0x145e   :  { %1933 = vrot.lane.b32.xlu0 %v1931_v55, %s2589_s17 }
0x145f   :  { %v2046_v57 = vpop.permute.xlu1 %2045  ;;  %v1924_v59 = vpop.permute.xlu0 %1923 }
0x1460   :  { %v2048_v58 = vmul.f32 %v2574_v56, %v2046_v57  ;;  %v1926_v60 = vmul.f32 %v2572_v53, %v1924_v59 }
0x1462   :  { %2050 = vrot.lane.b32.xlu1 %v2048_v58, %s2589_s17 }
0x1463   :  { %v2041_v61 = vpop.permute.xlu1 %2040 }
0x1464   :  { %v2043_v63 = vmul.f32 %v2574_v56, %v2041_v61 }
0x14d0   :  { %v1934_v2 = vpop.permute.xlu0 %1933 }
0x14d1   :  { %v1936_v62 = vadd.f32 %v1934_v2, %v1926_v60 }
0x14d3   :  { %2575 = vtanh.f32 %v1936_v62 }
0x14d4   :  { %v2051_v9 = vpop.permute.xlu1 %2050 }
0x14d5   :  { %v2053_v10 = vadd.f32 %v2051_v9, %v2043_v63 }
0x14d7   :  { %2577 = vtanh.f32 %v2053_v10 }
0x14e0   :  { %v2576_v0 = vpop.eup %2575 }
0x14e1   :  { %1939 = vrot.lane.b32.xlu0 %v2576_v0, %s2590_s22 }
0x14e4   :  { %v2578_v1 = vpop.eup %2577 }
0x14e5   :  { %2056 = vrot.lane.b32.xlu1 %v2578_v1, %s2590_s22 }
0x14e9   :  { %1949 = vrot.lane.b32.xlu1 %v1936_v62, %s2591_s23 }
0x14ed   :  { %2066 = vrot.lane.b32.xlu1 %v2053_v10, %s2591_s23 }
0x1553   :  { %v1940_v3 = vpop.permute.xlu0 %1939 }
0x1554   :  { %v1942_v4 = vmul.f32 %v2572_v53, %v1940_v3 }
0x1556   :  { %1944 = vrot.lane.b32.xlu0 %v1942_v4, %s2589_s17 }
0x1557   :  { %v2057_v5 = vpop.permute.xlu1 %2056 }
0x1558   :  { %v2059_v6 = vmul.f32 %v2574_v56, %v2057_v5 }
0x155a   :  { %2061 = vrot.lane.b32.xlu0 %v2059_v6, %s2589_s17 }
0x155b   :  { %v1950_v7 = vpop.permute.xlu1 %1949 }
0x155c   :  { %1952 = vst.msk [vmem:[#allocation3] sm:$0xff] %vm173_vm0, %v1950_v7 }
0x155f   :  { %v2067_v11 = vpop.permute.xlu1 %2066 }
0x1560   :  { %2069 = vst.msk [vmem:[#allocation5] sm:$0xff] %vm173_vm0, %v2067_v11 }
0x1563   :  { %v2079_v12 = vld [vmem:[#allocation3] sm:$0xff] }
0x1564   :  { %2080 = vst.msk [vmem:[%s3135_s7] sm:$0xff] %vm173_vm0, %v2079_v12 }
0x1567   :  { %v2081_v8 = vld [vmem:[#allocation5] sm:$0xff] }
0x1568   :  { %2189 = vst.msk [vmem:[%s3135_s7 + $0x8] sm:$0xff] %vm173_vm0, %v2081_v8 }
0x15c8   :  { %v1945_v13 = vpop.permute.xlu0 %1944 }
0x15c9   :  { %1947 = vst.msk [vmem:[#allocation2] sm:$0xff] %vm173_vm0, %v1945_v13  ;;  %2185 = vst.msk [vmem:[%s3132_s4 + $0x38] sm:$0xff] %vm173_vm0, %v1945_v13 }
0x15cc   :  { %v2062_v14 = vpop.permute.xlu0 %2061 }
0x15cd   :  { %2064 = vst.msk [vmem:[#allocation4] sm:$0xff] %vm173_vm0, %v2062_v14  ;;  %2070 = vst.msk [vmem:[%s3133_s5] sm:$0xff] %vm173_vm0, %v2062_v14 }
0x15d0   :  { %v2074_v15 = vld [vmem:[#allocation2] sm:$0xff] }
0x15d1   :  { %2075 = vst.msk [vmem:[%s3134_s6] sm:$0xff] %vm173_vm0, %v2074_v15 }
0x15d4   :  { %v2076_v16 = vld [vmem:[#allocation4] sm:$0xff] }
0x15d5   :  { %2188 = vst.msk [vmem:[%s3134_s6 + $0x8] sm:$0xff] %vm173_vm0, %v2076_v16 }

</bundles_post_ra>
